<compile_context>
chip_gen: v7x
topology: tpu7x:2x2x1
jax: 0.10.0
libtpu: 0.0.40
codegen_flags: <defaults>
</compile_context>

<pallas_src>
import functools

import numpy as np

import jax
import jax.numpy as jnp
from jax.experimental import pallas as pl
from jax.experimental.pallas import tpu as pltpu

EPS = 1e-5


def _round_up(x, m):
    return (x + m - 1) // m * m


# ----------------------------- Pallas kernel --------------------------------
def _csp_resnet_kernel(x1_ref, x2_ref, t1_ref, tcsp_ref, t2_ref,
                       p12_ref, p2_ref, g12_ref, be12_ref, g2_ref, be2_ref,
                       bcsp_ref, out_ref,
                       x1p_s, a1p_s,
                       *, B, H, W, C1, C2):
    M = B * H                    # matmul rows (one per (b, h))
    WC1 = W * C1                 # lanes of one x1 row slab
    NW = W * C2                  # lanes of one output row slab
    inv_cnt = 1.0 / float(B * H * W)   # BN population size per channel
    f32 = jnp.float32
    bf16 = jnp.bfloat16

    # ---- x1 with an H-only halo (conv1 padding=2 along H) -------------------
    # W-border handling is baked into the Toeplitz weights, so no W padding
    # and no narrow lane-offset halo stores are needed.
    x1p_s[:, 0:2, :] = jnp.zeros((B, 2, WC1), bf16)
    x1p_s[:, 2 + H:4 + H, :] = jnp.zeros((B, 2, WC1), bf16)
    x1p_s[:, 2:2 + H, :] = x1_ref[...]

    # ---- stage 1: conv1(3x3, dil 2) + resnet 1x1 shortcut -------------------
    # 3 per-row-tap bf16 matmuls accumulated in f32 (no im2col scratch).
    y12 = jnp.zeros((M, 2 * NW), f32)
    for t in range(3):                                   # dilation-2 row taps
        tap = x1p_s[:, 2 * t:2 * t + H, :].reshape(M, WC1)
        y12 = y12 + jnp.dot(tap, t1_ref[t], preferred_element_type=f32)
    # CSP 1x1 shortcut on x2 (no BN on this branch in forward()).
    ycsp = jnp.dot(x2_ref[...], tcsp_ref[...], preferred_element_type=f32)

    # ---- fused train-mode BatchNorm for bn1 & bn_sc (two-pass, biased var) --
    # Row reduction FIRST (exact f32 jnp.sum), then a tiny single-row dot with
    # the 0/1 group-sum matrix p12 -> per-channel sums broadcast to every lane
    # of the channel group.
    rs = jnp.sum(y12, axis=0, keepdims=True)                          # (1, 2NW)
    mean_bc = jnp.dot(rs, p12_ref[...], preferred_element_type=f32) * inv_cnt
    cen = y12 - mean_bc
    rss = jnp.sum(cen * cen, axis=0, keepdims=True)
    var_bc = jnp.dot(rss, p12_ref[...], preferred_element_type=f32) * inv_cnt
    y12n = cen * jax.lax.rsqrt(var_bc + EPS) * g12_ref[...] + be12_ref[...]

    act1 = jnp.maximum(y12n[:, :NW], 0.0)        # relu1 output
    sc_b = y12n[:, NW:2 * NW]                    # shortcut_bn output

    # ---- act1 with an H-only halo (conv2 padding=1 along H) -----------------
    # bf16 scratch: the store doubles as the single f32->bf16 operand cast.
    a1p_s[:, 0:1, :] = jnp.zeros((B, 1, NW), bf16)
    a1p_s[:, 1 + H:2 + H, :] = jnp.zeros((B, 1, NW), bf16)
    a1p_s[:, 1:1 + H, :] = act1.reshape(B, H, NW).astype(bf16)

    # ---- stage 2: conv2(3x3) as 3 per-row-tap matmuls -----------------------
    y2 = jnp.zeros((M, NW), f32)
    for t in range(3):
        tap = a1p_s[:, t:t + H, :].reshape(M, NW)
        y2 = y2 + jnp.dot(tap, t2_ref[t], preferred_element_type=f32)

    # ---- bn2 (two-pass) + residual add + relu2 ------------------------------
    rs2 = jnp.sum(y2, axis=0, keepdims=True)
    mean2_bc = jnp.dot(rs2, p2_ref[...], preferred_element_type=f32) * inv_cnt
    cen2 = y2 - mean2_bc
    rss2 = jnp.sum(cen2 * cen2, axis=0, keepdims=True)
    var2_bc = jnp.dot(rss2, p2_ref[...], preferred_element_type=f32) * inv_cnt
    b2n = cen2 * jax.lax.rsqrt(var2_bc + EPS) * g2_ref[...] + be2_ref[...]

    res = jnp.maximum(b2n + sc_b, 0.0)           # ResNet branch output
    short = ycsp + bcsp_ref[...]                 # CSP branch keeps its conv bias

    # ---- single dense, unmasked 128-lane store ------------------------------
    out_ref[...] = jnp.concatenate([res, short], axis=-1)


# ------------------------- host-side weight prepack --------------------------
def pack_params(p, W):
    """One-time prepack: per-row-tap banded (Toeplitz-along-W) conv weights in
    bf16 over the UNPADDED W*C lane slab (out-of-range W taps omitted ==
    W zero-padding), BN 0/1 group-sum matrices and pre-broadcast affine / bias
    lane vectors in f32."""
    C2, C1 = p["conv1_w"].shape[0], p["conv1_w"].shape[1]
    WC1, NW = W * C1, W * C2

    w1 = np.asarray(p["conv1_w"], np.float32)               # (C2, C1, 3, 3)
    w2 = np.asarray(p["conv2_w"], np.float32)               # (C2, C2, 3, 3)
    wsc = np.asarray(p["sc_w"], np.float32)[:, :, 0, 0]     # (C2, C1)
    wcsp = np.asarray(p["csp_w"], np.float32)[:, :, 0, 0]   # (C2, C1)

    # t1[ky]: x1 row slab shifted by (2*ky - 2) rows -> [conv1 | resnet-1x1-sc]
    # (the 1x1 shortcut rides the centre, unshifted tap ky == 1).
    t1 = np.zeros((3, WC1, 2 * NW), np.float32)
    t2 = np.zeros((3, NW, NW), np.float32)
    for w in range(W):
        for ky in range(3):
            for kx in range(3):
                wi = w + 2 * kx - 2                       # conv1: dil 2, pad 2
                if 0 <= wi < W:
                    t1[ky, wi * C1:(wi + 1) * C1, w * C2:(w + 1) * C2] = w1[:, :, ky, kx].T
                wj = w + kx - 1                           # conv2: dil 1, pad 1
                if 0 <= wj < W:
                    t2[ky, wj * C2:(wj + 1) * C2, w * C2:(w + 1) * C2] = w2[:, :, ky, kx].T
        t1[1, w * C1:(w + 1) * C1, NW + w * C2:NW + (w + 1) * C2] = wsc.T

    tcsp = np.zeros((WC1, NW), np.float32)
    for w in range(W):
        tcsp[w * C1:(w + 1) * C1, w * C2:(w + 1) * C2] = wcsp.T

    # 0/1 channel-group matrices: lane w*C2 + c belongs to channel c.
    s2 = np.zeros((NW, C2), np.float32)
    for w in range(W):
        for c in range(C2):
            s2[w * C2 + c, c] = 1.0
    s12 = np.zeros((2 * NW, 2 * C2), np.float32)
    s12[:NW, :C2] = s2
    s12[NW:, C2:] = s2
    p12 = s12 @ s12.T                     # group-sum / exact broadcast matrix
    p2 = s2 @ s2.T

    g12 = np.concatenate([np.asarray(p["bn1_g"]), np.asarray(p["bnsc_g"])]).astype(np.float32)
    be12 = np.concatenate([np.asarray(p["bn1_b"]), np.asarray(p["bnsc_b"])]).astype(np.float32)

    # NOTE: conv1/conv2/resnet-shortcut conv biases are intentionally NOT
    # packed -- train-mode BN mean subtraction cancels them exactly.  (This
    # would NOT hold in eval mode with running statistics.)
    return dict(
        t1=jnp.asarray(t1, jnp.bfloat16),
        tcsp=jnp.asarray(tcsp, jnp.bfloat16),
        t2=jnp.asarray(t2, jnp.bfloat16),
        p12=jnp.asarray(p12),
        p2=jnp.asarray(p2),
        g12=jnp.asarray(g12[None, :] @ s12.T),                               # (1, 2*NW)
        be12=jnp.asarray(be12[None, :] @ s12.T),                             # (1, 2*NW)
        g2=jnp.asarray(np.asarray(p["bn2_g"], np.float32)[None, :] @ s2.T),  # (1, NW)
        be2=jnp.asarray(np.asarray(p["bn2_b"], np.float32)[None, :] @ s2.T), # (1, NW)
        bcsp=jnp.asarray(np.asarray(p["csp_b"], np.float32)[None, :] @ s2.T),# (1, NW)
    )


# ------------------------------ forward wrapper -------------------------------
def csp_resnet_forward(x_nchw, packed, c1, c2):
    """x_nchw: (B, Cin, H, W) float32 -> (B, Cout, H, W) float32."""
    B, _, H, W = x_nchw.shape

    # NCHW -> channel-last with W folded into lanes (layout plumbing only);
    # the bf16 cast here is the MXU-operand cast (same as the bf16 reference).
    x = jnp.transpose(x_nchw.astype(jnp.float32), (0, 2, 3, 1))
    x1f = x[..., :c1].reshape(B, H, W * c1).astype(jnp.bfloat16)
    x2f = x[..., c1:].reshape(B * H, W * c1).astype(jnp.bfloat16)

    kernel = functools.partial(_csp_resnet_kernel, B=B, H=H, W=W, C1=c1, C2=c2)
    vmem = pl.BlockSpec(memory_space=pltpu.MemorySpace.VMEM)
    hp1 = _round_up(H + 4, 8)     # conv1 needs 2 halo rows top + bottom
    hp2 = _round_up(H + 2, 8)     # conv2 needs 1 halo row top + bottom

    out_flat = pl.pallas_call(
        kernel,
        out_shape=jax.ShapeDtypeStruct((B * H, 2 * W * c2), jnp.float32),
        in_specs=[vmem] * 12,
        out_specs=vmem,
        scratch_shapes=[
            pltpu.VMEM((B, hp1, W * c1), jnp.bfloat16),   # H-haloed x1
            pltpu.VMEM((B, hp2, W * c2), jnp.bfloat16),   # H-haloed act1
        ],
    )(x1f, x2f, packed["t1"], packed["tcsp"], packed["t2"],
      packed["p12"], packed["p2"], packed["g12"], packed["be12"],
      packed["g2"], packed["be2"], packed["bcsp"])

    # untangle lanes: (B*H, [branch, w, c]) -> NCHW (layout plumbing only).
    out = out_flat.reshape(B, H, 2, W, c2)
    out = jnp.transpose(out, (0, 2, 4, 1, 3)).reshape(B, 2 * c2, H, W)
    return out


# ------------------------- pure-JAX reference (NCHW) -------------------------
def _ref_bn(y, g, b):
    mean = y.mean(axis=(0, 2, 3), keepdims=True)
    var = ((y - mean) ** 2).mean(axis=(0, 2, 3), keepdims=True)
    return (y - mean) / jnp.sqrt(var + EPS) * g.reshape(1, -1, 1, 1) + b.reshape(1, -1, 1, 1)


def ref_forward(x, p, conv_dtype=jnp.float32):
    """Reference.  conv_dtype=bfloat16 mirrors the kernel's MXU operand
    precision (accumulation and all BN math stay f32 in both)."""
    dn = ("NCHW", "OIHW", "NCHW")
    c1 = x.shape[1] // 2
    x1, x2 = x[:, :c1], x[:, c1:]

    def conv(lhs, w, pad, dil):
        return jax.lax.conv_general_dilated(
            lhs.astype(conv_dtype), w.astype(conv_dtype), (1, 1), pad,
            rhs_dilation=dil, dimension_numbers=dn,
            preferred_element_type=jnp.float32)

    y = conv(x1, p["conv1_w"], ((2, 2), (2, 2)), (2, 2)) + p["conv1_b"].reshape(1, -1, 1, 1)
    y = jnp.maximum(_ref_bn(y, p["bn1_g"], p["bn1_b"]), 0.0)
    y2 = conv(y, p["conv2_w"], ((1, 1), (1, 1)), (1, 1)) + p["conv2_b"].reshape(1, -1, 1, 1)
    y2 = _ref_bn(y2, p["bn2_g"], p["bn2_b"])
    sc = conv(x1, p["sc_w"], ((0, 0), (0, 0)), (1, 1)) + p["sc_b"].reshape(1, -1, 1, 1)
    sc = _ref_bn(sc, p["bnsc_g"], p["bnsc_b"])
    res = jnp.maximum(y2 + sc, 0.0)
    short = conv(x2, p["csp_w"], ((0, 0), (0, 0)), (1, 1)) + p["csp_b"].reshape(1, -1, 1, 1)
    return jnp.concatenate([res, short], axis=1)


# ----------------------------- deterministic init ----------------------------
def init_params(key, in_channels, out_channels):
    c1, c2 = in_channels // 2, out_channels // 2
    ks = jax.random.split(key, 12)

    def conv_init(k, co, ci, kh, kw):
        bound = 1.0 / jnp.sqrt(ci * kh * kw)
        kw_, kb_ = jax.random.split(k)
        w = jax.random.uniform(kw_, (co, ci, kh, kw), jnp.float32, -bound, bound)
        b = jax.random.uniform(kb_, (co,), jnp.float32, -bound, bound)
        return w, b

    conv1_w, conv1_b = conv_init(ks[0], c2, c1, 3, 3)
    conv2_w, conv2_b = conv_init(ks[1], c2, c2, 3, 3)
    sc_w, sc_b = conv_init(ks[2], c2, c1, 1, 1)
    csp_w, csp_b = conv_init(ks[3], c2, c1, 1, 1)

    bn1_g = 1.0 + 0.1 * jax.random.normal(ks[4], (c2,), jnp.float32)
    bn1_b = 0.1 * jax.random.normal(ks[5], (c2,), jnp.float32)
    bn2_g = 1.0 + 0.1 * jax.random.normal(ks[6], (c2,), jnp.float32)
    bn2_b = 0.1 * jax.random.normal(ks[7], (c2,), jnp.float32)
    bnsc_g = 1.0 + 0.1 * jax.random.normal(ks[8], (c2,), jnp.float32)
    bnsc_b = 0.1 * jax.random.normal(ks[9], (c2,), jnp.float32)
    # TODO(synk): Csp_ResNet.shortcut_convbn is constructed in __init__ but never
    # used in forward(), so no parameters are materialized for it here.

    return dict(conv1_w=conv1_w, conv1_b=conv1_b, bn1_g=bn1_g, bn1_b=bn1_b,
                conv2_w=conv2_w, conv2_b=conv2_b, bn2_g=bn2_g, bn2_b=bn2_b,
                sc_w=sc_w, sc_b=sc_b, bnsc_g=bnsc_g, bnsc_b=bnsc_b,
                csp_w=csp_w, csp_b=csp_b)


if __name__ == "__main__":
    key = jax.random.PRNGKey(0)
    k_x, k_p = jax.random.split(key)

    B, Cin, Cout, H, W = 2, 4, 8, 16, 16
    x = jax.random.normal(k_x, (B, Cin, H, W), jnp.float32)
    params = init_params(k_p, Cin, Cout)
    packed = pack_params(params, W)

    out = jax.block_until_ready(csp_resnet_forward(x, packed, Cin // 2, Cout // 2))
    assert out.shape == (B, Cout, H, W), out.shape

    # Tight check vs. a reference with the same bf16 MXU-operand precision.
    ref_bf16 = jax.block_until_ready(ref_forward(x, params, jnp.bfloat16))
    err_bf = jnp.max(jnp.abs(out - ref_bf16))
    assert jnp.allclose(out, ref_bf16, rtol=5e-3, atol=5e-3), f"bf16-ref max abs err {err_bf}"

    # Sanity check vs. the exact f32 module semantics (difference bounded by
    # bf16 rounding of the conv operands only).
    ref_f32 = jax.block_until_ready(ref_forward(x, params, jnp.float32))
    err_f32 = jnp.max(jnp.abs(out - ref_f32))
    assert jnp.allclose(out, ref_f32, rtol=5e-2, atol=5e-2), f"f32-ref max abs err {err_f32}"

    print("KERNEL_OK")
</pallas_src>

<mosaic_0001>
module attributes {stable_mosaic.version = 11 : i64} {
  func.func @_csp_resnet_kernel(%arg0: memref<2x16x32xbf16, #tpu.memory_space<vmem>>, %arg1: memref<32x32xbf16, #tpu.memory_space<vmem>>, %arg2: memref<3x32x128xbf16, #tpu.memory_space<vmem>>, %arg3: memref<32x64xbf16, #tpu.memory_space<vmem>>, %arg4: memref<3x64x64xbf16, #tpu.memory_space<vmem>>, %arg5: memref<128x128xf32, #tpu.memory_space<vmem>>, %arg6: memref<64x64xf32, #tpu.memory_space<vmem>>, %arg7: memref<1x128xf32, #tpu.memory_space<vmem>>, %arg8: memref<1x128xf32, #tpu.memory_space<vmem>>, %arg9: memref<1x64xf32, #tpu.memory_space<vmem>>, %arg10: memref<1x64xf32, #tpu.memory_space<vmem>>, %arg11: memref<1x64xf32, #tpu.memory_space<vmem>>, %arg12: memref<32x128xf32, #tpu.memory_space<vmem>>, %arg13: memref<2x24x32xbf16, #tpu.memory_space<vmem>>, %arg14: memref<2x24x64xbf16, #tpu.memory_space<vmem>>) attributes {dimension_semantics = [], scalar_prefetch = 0 : i64, scratch_operands = 2 : i64, tpu.core_type = #tpu.core_type<tc>} {
    %cst = arith.constant 0.000000e+00 : bf16
    %0 = vector.broadcast %cst : bf16 to vector<2x2x32xbf16>
    %c0 = arith.constant 0 : index
    %c0_0 = arith.constant 0 : index
    %c0_1 = arith.constant 0 : index
    %1 = vector.load %arg13[%c0, %c0_0, %c0_1] : memref<2x24x32xbf16, #tpu.memory_space<vmem>>, vector<2x2x32xbf16>
    tpu.vector_store %arg13[%c0, %c0_0, %c0_1], %0 {strides = array<i32>} : memref<2x24x32xbf16, #tpu.memory_space<vmem>>, vector<2x2x32xbf16>,
    %cst_2 = arith.constant 0.000000e+00 : bf16
    %2 = vector.broadcast %cst_2 : bf16 to vector<2x2x32xbf16>
    %c0_3 = arith.constant 0 : index
    %c18 = arith.constant 18 : index
    %c0_4 = arith.constant 0 : index
    %3 = vector.load %arg13[%c0_3, %c18, %c0_4] : memref<2x24x32xbf16, #tpu.memory_space<vmem>>, vector<2x2x32xbf16>
    tpu.vector_store %arg13[%c0_3, %c18, %c0_4], %2 {strides = array<i32>} : memref<2x24x32xbf16, #tpu.memory_space<vmem>>, vector<2x2x32xbf16>,
    %c0_5 = arith.constant 0 : index
    %c0_6 = arith.constant 0 : index
    %c0_7 = arith.constant 0 : index
    %4 = vector.load %arg0[%c0_5, %c0_6, %c0_7] : memref<2x16x32xbf16, #tpu.memory_space<vmem>>, vector<2x16x32xbf16>
    %c0_8 = arith.constant 0 : index
    %c2 = arith.constant 2 : index
    %c0_9 = arith.constant 0 : index
    %5 = vector.load %arg13[%c0_8, %c2, %c0_9] : memref<2x24x32xbf16, #tpu.memory_space<vmem>>, vector<2x16x32xbf16>
    tpu.vector_store %arg13[%c0_8, %c2, %c0_9], %4 {strides = array<i32>} : memref<2x24x32xbf16, #tpu.memory_space<vmem>>, vector<2x16x32xbf16>,
    %cst_10 = arith.constant 0.000000e+00 : f32
    %6 = vector.broadcast %cst_10 : f32 to vector<32x128xf32>
    %c0_11 = arith.constant 0 : index
    %c0_12 = arith.constant 0 : index
    %c0_13 = arith.constant 0 : index
    %7 = vector.load %arg13[%c0_11, %c0_12, %c0_13] : memref<2x24x32xbf16, #tpu.memory_space<vmem>>, vector<2x16x32xbf16>
    %8 = vector.shape_cast %7 : vector<2x16x32xbf16> to vector<32x32xbf16>
    %c0_14 = arith.constant 0 : index
    %c0_15 = arith.constant 0 : index
    %c0_16 = arith.constant 0 : index
    %9 = vector.load %arg2[%c0_14, %c0_15, %c0_16] : memref<3x32x128xbf16, #tpu.memory_space<vmem>>, vector<1x32x128xbf16>
    %10 = vector.shape_cast %9 : vector<1x32x128xbf16> to vector<32x128xbf16>
    %cst_17 = arith.constant dense<0.000000e+00> : vector<32x128xf32>
    %11 = tpu.matmul %8, %10, %cst_17 {dimension_numbers = #tpu.dot_dimension_numbers<[1], [0], [0], [1], [0, 0, 1, 1], [], []>} : vector<32x32xbf16>, vector<32x128xbf16>, vector<32x128xf32> -> vector<32x128xf32>
    %12 = arith.addf %6, %11 : vector<32x128xf32>
    %c0_18 = arith.constant 0 : index
    %c2_19 = arith.constant 2 : index
    %c0_20 = arith.constant 0 : index
    %13 = vector.load %arg13[%c0_18, %c2_19, %c0_20] : memref<2x24x32xbf16, #tpu.memory_space<vmem>>, vector<2x16x32xbf16>
    %14 = vector.shape_cast %13 : vector<2x16x32xbf16> to vector<32x32xbf16>
    %c1 = arith.constant 1 : index
    %c0_21 = arith.constant 0 : index
    %c0_22 = arith.constant 0 : index
    %15 = vector.load %arg2[%c1, %c0_21, %c0_22] : memref<3x32x128xbf16, #tpu.memory_space<vmem>>, vector<1x32x128xbf16>
    %16 = vector.shape_cast %15 : vector<1x32x128xbf16> to vector<32x128xbf16>
    %cst_23 = arith.constant dense<0.000000e+00> : vector<32x128xf32>
    %17 = tpu.matmul %14, %16, %cst_23 {dimension_numbers = #tpu.dot_dimension_numbers<[1], [0], [0], [1], [0, 0, 1, 1], [], []>} : vector<32x32xbf16>, vector<32x128xbf16>, vector<32x128xf32> -> vector<32x128xf32>
    %18 = arith.addf %12, %17 : vector<32x128xf32>
    %c0_24 = arith.constant 0 : index
    %c4 = arith.constant 4 : index
    %c0_25 = arith.constant 0 : index
    %19 = vector.load %arg13[%c0_24, %c4, %c0_25] : memref<2x24x32xbf16, #tpu.memory_space<vmem>>, vector<2x16x32xbf16>
    %20 = vector.shape_cast %19 : vector<2x16x32xbf16> to vector<32x32xbf16>
    %c2_26 = arith.constant 2 : index
    %c0_27 = arith.constant 0 : index
    %c0_28 = arith.constant 0 : index
    %21 = vector.load %arg2[%c2_26, %c0_27, %c0_28] : memref<3x32x128xbf16, #tpu.memory_space<vmem>>, vector<1x32x128xbf16>
    %22 = vector.shape_cast %21 : vector<1x32x128xbf16> to vector<32x128xbf16>
    %cst_29 = arith.constant dense<0.000000e+00> : vector<32x128xf32>
    %23 = tpu.matmul %20, %22, %cst_29 {dimension_numbers = #tpu.dot_dimension_numbers<[1], [0], [0], [1], [0, 0, 1, 1], [], []>} : vector<32x32xbf16>, vector<32x128xbf16>, vector<32x128xf32> -> vector<32x128xf32>
    %24 = arith.addf %18, %23 : vector<32x128xf32>
    %c0_30 = arith.constant 0 : index
    %c0_31 = arith.constant 0 : index
    %25 = vector.load %arg1[%c0_30, %c0_31] : memref<32x32xbf16, #tpu.memory_space<vmem>>, vector<32x32xbf16>
    %c0_32 = arith.constant 0 : index
    %c0_33 = arith.constant 0 : index
    %26 = vector.load %arg3[%c0_32, %c0_33] : memref<32x64xbf16, #tpu.memory_space<vmem>>, vector<32x64xbf16>
    %cst_34 = arith.constant dense<0.000000e+00> : vector<32x64xf32>
    %27 = tpu.matmul %25, %26, %cst_34 {dimension_numbers = #tpu.dot_dimension_numbers<[1], [0], [0], [1], [0, 0, 1, 1], [], []>} : vector<32x32xbf16>, vector<32x64xbf16>, vector<32x64xf32> -> vector<32x64xf32>
    %cst_35 = arith.constant dense<0.000000e+00> : vector<128xf32>
    %28 = vector.multi_reduction <add>, %24, %cst_35 [0] : vector<32x128xf32> to vector<128xf32>
    %29 = vector.shape_cast %28 : vector<128xf32> to vector<1x128xf32>
    %c0_36 = arith.constant 0 : index
    %c0_37 = arith.constant 0 : index
    %30 = vector.load %arg5[%c0_36, %c0_37] : memref<128x128xf32, #tpu.memory_space<vmem>>, vector<128x128xf32>
    %cst_38 = arith.constant dense<0.000000e+00> : vector<1x128xf32>
    %31 = tpu.matmul %29, %30, %cst_38 {dimension_numbers = #tpu.dot_dimension_numbers<[1], [0], [0], [1], [0, 0, 1, 1], [], []>} : vector<1x128xf32>, vector<128x128xf32>, vector<1x128xf32> -> vector<1x128xf32>
    %cst_39 = arith.constant 0.001953125 : f32
    %32 = vector.broadcast %cst_39 : f32 to vector<1x128xf32>
    %33 = arith.mulf %31, %32 : vector<1x128xf32>
    %34 = vector.broadcast %33 : vector<1x128xf32> to vector<32x128xf32>
    %35 = arith.subf %24, %34 : vector<32x128xf32>
    %36 = arith.mulf %35, %35 : vector<32x128xf32>
    %cst_40 = arith.constant dense<0.000000e+00> : vector<128xf32>
    %37 = vector.multi_reduction <add>, %36, %cst_40 [0] : vector<32x128xf32> to vector<128xf32>
    %38 = vector.shape_cast %37 : vector<128xf32> to vector<1x128xf32>
    %c0_41 = arith.constant 0 : index
    %c0_42 = arith.constant 0 : index
    %39 = vector.load %arg5[%c0_41, %c0_42] : memref<128x128xf32, #tpu.memory_space<vmem>>, vector<128x128xf32>
    %cst_43 = arith.constant dense<0.000000e+00> : vector<1x128xf32>
    %40 = tpu.matmul %38, %39, %cst_43 {dimension_numbers = #tpu.dot_dimension_numbers<[1], [0], [0], [1], [0, 0, 1, 1], [], []>} : vector<1x128xf32>, vector<128x128xf32>, vector<1x128xf32> -> vector<1x128xf32>
    %cst_44 = arith.constant 0.001953125 : f32
    %41 = vector.broadcast %cst_44 : f32 to vector<1x128xf32>
    %42 = arith.mulf %40, %41 : vector<1x128xf32>
    %cst_45 = arith.constant 9.99999974E-6 : f32
    %43 = vector.broadcast %cst_45 : f32 to vector<1x128xf32>
    %44 = arith.addf %42, %43 : vector<1x128xf32>
    %45 = math.rsqrt %44 : vector<1x128xf32>
    %46 = vector.broadcast %45 : vector<1x128xf32> to vector<32x128xf32>
    %47 = arith.mulf %35, %46 : vector<32x128xf32>
    %c0_46 = arith.constant 0 : index
    %c0_47 = arith.constant 0 : index
    %48 = vector.load %arg7[%c0_46, %c0_47] : memref<1x128xf32, #tpu.memory_space<vmem>>, vector<1x128xf32>
    %49 = vector.broadcast %48 : vector<1x128xf32> to vector<32x128xf32>
    %50 = arith.mulf %47, %49 : vector<32x128xf32>
    %c0_48 = arith.constant 0 : index
    %c0_49 = arith.constant 0 : index
    %51 = vector.load %arg8[%c0_48, %c0_49] : memref<1x128xf32, #tpu.memory_space<vmem>>, vector<1x128xf32>
    %52 = vector.broadcast %51 : vector<1x128xf32> to vector<32x128xf32>
    %53 = arith.addf %50, %52 : vector<32x128xf32>
    %54 = vector.extract_strided_slice %53 {offsets = [0, 0], sizes = [32, 64], strides = [1, 1]} : vector<32x128xf32> to vector<32x64xf32>
    %cst_50 = arith.constant 0.000000e+00 : f32
    %55 = vector.broadcast %cst_50 : f32 to vector<32x64xf32>
    %56 = arith.maximumf %54, %55 : vector<32x64xf32>
    %57 = vector.extract_strided_slice %53 {offsets = [0, 64], sizes = [32, 64], strides = [1, 1]} : vector<32x128xf32> to vector<32x64xf32>
    %cst_51 = arith.constant 0.000000e+00 : bf16
    %58 = vector.broadcast %cst_51 : bf16 to vector<2x1x64xbf16>
    %c0_52 = arith.constant 0 : index
    %c0_53 = arith.constant 0 : index
    %c0_54 = arith.constant 0 : index
    %59 = vector.load %arg14[%c0_52, %c0_53, %c0_54] : memref<2x24x64xbf16, #tpu.memory_space<vmem>>, vector<2x1x64xbf16>
    tpu.vector_store %arg14[%c0_52, %c0_53, %c0_54], %58 {strides = array<i32>} : memref<2x24x64xbf16, #tpu.memory_space<vmem>>, vector<2x1x64xbf16>,
    %cst_55 = arith.constant 0.000000e+00 : bf16
    %60 = vector.broadcast %cst_55 : bf16 to vector<2x1x64xbf16>
    %c0_56 = arith.constant 0 : index
    %c17 = arith.constant 17 : index
    %c0_57 = arith.constant 0 : index
    %61 = vector.load %arg14[%c0_56, %c17, %c0_57] : memref<2x24x64xbf16, #tpu.memory_space<vmem>>, vector<2x1x64xbf16>
    tpu.vector_store %arg14[%c0_56, %c17, %c0_57], %60 {strides = array<i32>} : memref<2x24x64xbf16, #tpu.memory_space<vmem>>, vector<2x1x64xbf16>,
    %62 = vector.shape_cast %56 : vector<32x64xf32> to vector<2x16x64xf32>
    %63 = arith.truncf %62 : vector<2x16x64xf32> to vector<2x16x64xbf16>
    %c0_58 = arith.constant 0 : index
    %c1_59 = arith.constant 1 : index
    %c0_60 = arith.constant 0 : index
    %64 = vector.load %arg14[%c0_58, %c1_59, %c0_60] : memref<2x24x64xbf16, #tpu.memory_space<vmem>>, vector<2x16x64xbf16>
    tpu.vector_store %arg14[%c0_58, %c1_59, %c0_60], %63 {strides = array<i32>} : memref<2x24x64xbf16, #tpu.memory_space<vmem>>, vector<2x16x64xbf16>,
    %cst_61 = arith.constant 0.000000e+00 : f32
    %65 = vector.broadcast %cst_61 : f32 to vector<32x64xf32>
    %c0_62 = arith.constant 0 : index
    %c0_63 = arith.constant 0 : index
    %c0_64 = arith.constant 0 : index
    %66 = vector.load %arg14[%c0_62, %c0_63, %c0_64] : memref<2x24x64xbf16, #tpu.memory_space<vmem>>, vector<2x16x64xbf16>
    %67 = vector.shape_cast %66 : vector<2x16x64xbf16> to vector<32x64xbf16>
    %c0_65 = arith.constant 0 : index
    %c0_66 = arith.constant 0 : index
    %c0_67 = arith.constant 0 : index
    %68 = vector.load %arg4[%c0_65, %c0_66, %c0_67] : memref<3x64x64xbf16, #tpu.memory_space<vmem>>, vector<1x64x64xbf16>
    %69 = vector.shape_cast %68 : vector<1x64x64xbf16> to vector<64x64xbf16>
    %cst_68 = arith.constant dense<0.000000e+00> : vector<32x64xf32>
    %70 = tpu.matmul %67, %69, %cst_68 {dimension_numbers = #tpu.dot_dimension_numbers<[1], [0], [0], [1], [0, 0, 1, 1], [], []>} : vector<32x64xbf16>, vector<64x64xbf16>, vector<32x64xf32> -> vector<32x64xf32>
    %71 = arith.addf %65, %70 : vector<32x64xf32>
    %c0_69 = arith.constant 0 : index
    %c1_70 = arith.constant 1 : index
    %c0_71 = arith.constant 0 : index
    %72 = vector.load %arg14[%c0_69, %c1_70, %c0_71] : memref<2x24x64xbf16, #tpu.memory_space<vmem>>, vector<2x16x64xbf16>
    %73 = vector.shape_cast %72 : vector<2x16x64xbf16> to vector<32x64xbf16>
    %c1_72 = arith.constant 1 : index
    %c0_73 = arith.constant 0 : index
    %c0_74 = arith.constant 0 : index
    %74 = vector.load %arg4[%c1_72, %c0_73, %c0_74] : memref<3x64x64xbf16, #tpu.memory_space<vmem>>, vector<1x64x64xbf16>
    %75 = vector.shape_cast %74 : vector<1x64x64xbf16> to vector<64x64xbf16>
    %cst_75 = arith.constant dense<0.000000e+00> : vector<32x64xf32>
    %76 = tpu.matmul %73, %75, %cst_75 {dimension_numbers = #tpu.dot_dimension_numbers<[1], [0], [0], [1], [0, 0, 1, 1], [], []>} : vector<32x64xbf16>, vector<64x64xbf16>, vector<32x64xf32> -> vector<32x64xf32>
    %77 = arith.addf %71, %76 : vector<32x64xf32>
    %c0_76 = arith.constant 0 : index
    %c2_77 = arith.constant 2 : index
    %c0_78 = arith.constant 0 : index
    %78 = vector.load %arg14[%c0_76, %c2_77, %c0_78] : memref<2x24x64xbf16, #tpu.memory_space<vmem>>, vector<2x16x64xbf16>
    %79 = vector.shape_cast %78 : vector<2x16x64xbf16> to vector<32x64xbf16>
    %c2_79 = arith.constant 2 : index
    %c0_80 = arith.constant 0 : index
    %c0_81 = arith.constant 0 : index
    %80 = vector.load %arg4[%c2_79, %c0_80, %c0_81] : memref<3x64x64xbf16, #tpu.memory_space<vmem>>, vector<1x64x64xbf16>
    %81 = vector.shape_cast %80 : vector<1x64x64xbf16> to vector<64x64xbf16>
    %cst_82 = arith.constant dense<0.000000e+00> : vector<32x64xf32>
    %82 = tpu.matmul %79, %81, %cst_82 {dimension_numbers = #tpu.dot_dimension_numbers<[1], [0], [0], [1], [0, 0, 1, 1], [], []>} : vector<32x64xbf16>, vector<64x64xbf16>, vector<32x64xf32> -> vector<32x64xf32>
    %83 = arith.addf %77, %82 : vector<32x64xf32>
    %cst_83 = arith.constant dense<0.000000e+00> : vector<64xf32>
    %84 = vector.multi_reduction <add>, %83, %cst_83 [0] : vector<32x64xf32> to vector<64xf32>
    %85 = vector.shape_cast %84 : vector<64xf32> to vector<1x64xf32>
    %c0_84 = arith.constant 0 : index
    %c0_85 = arith.constant 0 : index
    %86 = vector.load %arg6[%c0_84, %c0_85] : memref<64x64xf32, #tpu.memory_space<vmem>>, vector<64x64xf32>
    %cst_86 = arith.constant dense<0.000000e+00> : vector<1x64xf32>
    %87 = tpu.matmul %85, %86, %cst_86 {dimension_numbers = #tpu.dot_dimension_numbers<[1], [0], [0], [1], [0, 0, 1, 1], [], []>} : vector<1x64xf32>, vector<64x64xf32>, vector<1x64xf32> -> vector<1x64xf32>
    %cst_87 = arith.constant 0.001953125 : f32
    %88 = vector.broadcast %cst_87 : f32 to vector<1x64xf32>
    %89 = arith.mulf %87, %88 : vector<1x64xf32>
    %90 = vector.broadcast %89 : vector<1x64xf32> to vector<32x64xf32>
    %91 = arith.subf %83, %90 : vector<32x64xf32>
    %92 = arith.mulf %91, %91 : vector<32x64xf32>
    %cst_88 = arith.constant dense<0.000000e+00> : vector<64xf32>
    %93 = vector.multi_reduction <add>, %92, %cst_88 [0] : vector<32x64xf32> to vector<64xf32>
    %94 = vector.shape_cast %93 : vector<64xf32> to vector<1x64xf32>
    %c0_89 = arith.constant 0 : index
    %c0_90 = arith.constant 0 : index
    %95 = vector.load %arg6[%c0_89, %c0_90] : memref<64x64xf32, #tpu.memory_space<vmem>>, vector<64x64xf32>
    %cst_91 = arith.constant dense<0.000000e+00> : vector<1x64xf32>
    %96 = tpu.matmul %94, %95, %cst_91 {dimension_numbers = #tpu.dot_dimension_numbers<[1], [0], [0], [1], [0, 0, 1, 1], [], []>} : vector<1x64xf32>, vector<64x64xf32>, vector<1x64xf32> -> vector<1x64xf32>
    %cst_92 = arith.constant 0.001953125 : f32
    %97 = vector.broadcast %cst_92 : f32 to vector<1x64xf32>
    %98 = arith.mulf %96, %97 : vector<1x64xf32>
    %cst_93 = arith.constant 9.99999974E-6 : f32
    %99 = vector.broadcast %cst_93 : f32 to vector<1x64xf32>
    %100 = arith.addf %98, %99 : vector<1x64xf32>
    %101 = math.rsqrt %100 : vector<1x64xf32>
    %102 = vector.broadcast %101 : vector<1x64xf32> to vector<32x64xf32>
    %103 = arith.mulf %91, %102 : vector<32x64xf32>
    %c0_94 = arith.constant 0 : index
    %c0_95 = arith.constant 0 : index
    %104 = vector.load %arg9[%c0_94, %c0_95] : memref<1x64xf32, #tpu.memory_space<vmem>>, vector<1x64xf32>
    %105 = vector.broadcast %104 : vector<1x64xf32> to vector<32x64xf32>
    %106 = arith.mulf %103, %105 : vector<32x64xf32>
    %c0_96 = arith.constant 0 : index
    %c0_97 = arith.constant 0 : index
    %107 = vector.load %arg10[%c0_96, %c0_97] : memref<1x64xf32, #tpu.memory_space<vmem>>, vector<1x64xf32>
    %108 = vector.broadcast %107 : vector<1x64xf32> to vector<32x64xf32>
    %109 = arith.addf %106, %108 : vector<32x64xf32>
    %110 = arith.addf %109, %57 : vector<32x64xf32>
    %cst_98 = arith.constant 0.000000e+00 : f32
    %111 = vector.broadcast %cst_98 : f32 to vector<32x64xf32>
    %112 = arith.maximumf %110, %111 : vector<32x64xf32>
    %c0_99 = arith.constant 0 : index
    %c0_100 = arith.constant 0 : index
    %113 = vector.load %arg11[%c0_99, %c0_100] : memref<1x64xf32, #tpu.memory_space<vmem>>, vector<1x64xf32>
    %114 = vector.broadcast %113 : vector<1x64xf32> to vector<32x64xf32>
    %115 = arith.addf %27, %114 : vector<32x64xf32>
    %116 = tpu.concatenate %112, %115 in 1 : vector<32x64xf32>, vector<32x64xf32> -> vector<32x128xf32>
    %c0_101 = arith.constant 0 : index
    %c0_102 = arith.constant 0 : index
    %117 = vector.load %arg12[%c0_101, %c0_102] : memref<32x128xf32, #tpu.memory_space<vmem>>, vector<32x128xf32>
    tpu.vector_store %arg12[%c0_101, %c0_102], %116 {strides = array<i32>} : memref<32x128xf32, #tpu.memory_space<vmem>>, vector<32x128xf32>,
    return
  }
}

</mosaic_0001>

<bundles_post_ra>
// kernel: tpu_custom_call.1
= control target key start
LH: loop header
LB: loop body
LE: loop exit
PB: predicated region body
PF: predicated region fallthrough
CT: control target
= control target key end

     0   :  { %17 = vsyncpa [#allocation5], 0  ;;  %s2612_s0 = inlined_call_operand.hbm [shape: bf16[2,16,32], index: 0, kind: input, shape index: {}]   ;;  %s2613_s1 = inlined_call_operand.hbm [shape: bf16[32,32], index: 1, kind: input, shape index: {}]   ;;  %s2614_s2 = inlined_call_operand.hbm [shape: bf16[3,32,128], index: 2, kind: input, shape index: {}]   ;;  %s2615_s3 = inlined_call_operand.hbm [shape: bf16[32,64], index: 3, kind: input, shape index: {}]   ;;  %s2616_s4 = inlined_call_operand.hbm [shape: bf16[3,64,64], index: 4, kind: input, shape index: {}]   ;;  %s2617_s5 = inlined_call_operand.hbm [shape: f32[128,128], index: 5, kind: input, shape index: {}]   ;;  %s2618_s6 = inlined_call_operand.hbm [shape: f32[64,64], index: 6, kind: input, shape index: {}]   ;;  %s2619_s7 = inlined_call_operand.vmem [shape: f32[1,128], index: 7, kind: input, shape index: {}]   ;;  %s2620_s8 = inlined_call_operand.vmem [shape: f32[1,128], index: 8, kind: input, shape index: {}]   ;;  %s2621_s9 = inlined_call_operand.vmem [shape: f32[1,64], index: 9, kind: input, shape index: {}]   ;;  %s2622_s10 = inlined_call_operand.vmem [shape: f32[1,64], index: 10, kind: input, shape index: {}]   ;;  %s2623_s11 = inlined_call_operand.vmem [shape: f32[1,64], index: 11, kind: input, shape index: {}]   ;;  %s2624_s12 = inlined_call_operand.hbm [shape: f32[32,128], index: 12, kind: output, shape index: {}]  }
   0x1   :  { %18 = vsyncpa [#allocation8], 0 }
   0x2   :  { %19 = vsyncpa [#allocation11], 0 }
   0x3   :  { %20 = vsyncpa [#allocation14], 0 }
   0x4   :  { %21 = vsyncpa [#allocation6], 0  ;;  %s2189_s21 = smov [#allocation7]   ;;  %s2190_s23 = smov [#allocation10]  }
   0x5   :  { %s39_s22 = sshll.u32 %s2189_s21, 4  ;;  %s63_s24 = sshll.u32 %s2190_s23, 4  ;;  %s40_s22 = int_to_ptr.vmem [resolvable:$true] %s39_s22  ;;  %s2270_s24 = int_to_ptr.vmem [resolvable:$true] %s63_s24 }
   0x6   :  { %s2003_s27 = scalar_lea.hbm %s2613_s1, 256 }
   0x7   :  { %p2004_p0 = scmp.ne.s32.totalorder %s2613_s1, %s2003_s27  ;;  %p2007_p1 = scmp.lt.u32.totalorder %s2003_s27, %s2613_s1 }
   0x9   :  { %p2009_p2 = pnand %p2007_p1, %p2004_p0 }
   0xb   :  { %2012 = shalt.err (!%p2009_p2)
}
   0xc   :  { %s2013_s14 = scalar_lea.vmem %s40_s22, 256  ;;  %p2018_p4 = scmp.lt.s32.totalorder %s40_s22, %s40_s22 }
   0xd   :  { %p2014_p3 = scmp.ne.s32.totalorder %s40_s22, %s2013_s14  ;;  %p2019_p5 = scmp.lt.s32.totalorder %s2013_s14, %s2013_s14 }
   0xf   :  { %p2020_p6 = por %p2019_p5, %p2018_p4 }
  0x11   :  { %p2021_p7 = pnand %p2020_p6, %p2014_p3 }
  0x13   :  { %2024 = shalt.err (!%p2021_p7)
}
  0x14   :  { %s2191_s15 = smov 64   ;;  %s2192_s16 = smov 4  }
  0x15   :  { %45 = dma.hbm_to_vmem [thread:$0]  %s2613_s1, 256, %s40_s22, [#allocation8], %s2191_s15, %s2191_s15, %s2192_s16  }
  0x16   :  { %s2025_s21 = scalar_lea.hbm %s2615_s3, 256 }
  0x17   :  { %p2026_p8 = scmp.ne.s32.totalorder %s2615_s3, %s2025_s21  ;;  %p2029_p9 = scmp.lt.u32.totalorder %s2025_s21, %s2615_s3 }
  0x19   :  { %p2031_p10 = pnand %p2029_p9, %p2026_p8 }
  0x1b   :  { %2034 = shalt.err (!%p2031_p10)
}
  0x1c   :  { %s2035_s28 = scalar_lea.vmem %s2270_s24, 256  ;;  %p2040_p12 = scmp.lt.s32.totalorder %s2270_s24, %s2270_s24 }
  0x1d   :  { %p2036_p11 = scmp.ne.s32.totalorder %s2270_s24, %s2035_s28  ;;  %p2041_p13 = scmp.lt.s32.totalorder %s2035_s28, %s2035_s28 }
  0x1f   :  { %p2042_p0 = por %p2041_p13, %p2040_p12 }
  0x21   :  { %p2043_p1 = pnand %p2042_p0, %p2036_p11 }
  0x23   :  { %2046 = shalt.err (!%p2043_p1)
}
  0x24   :  { %69 = dma.hbm_to_vmem [thread:$0]  %s2615_s3, 256, %s2270_s24, [#allocation11], %s2191_s15, %s2191_s15, %s2192_s16  }
  0x25   :  { %s2193_s29 = smov [#allocation13]   ;;  %s2047_s17 = scalar_lea.hbm %s2617_s5, 2048 }
  0x26   :  { %s87_s30 = sshll.u32 %s2193_s29, 4  ;;  %p2048_p2 = scmp.ne.s32.totalorder %s2617_s5, %s2047_s17  ;;  %s88_s30 = int_to_ptr.vmem [resolvable:$true] %s87_s30 }
  0x27   :  { %p2051_p3 = scmp.lt.u32.totalorder %s2047_s17, %s2617_s5 }
  0x29   :  { %p2053_p4 = pnand %p2051_p3, %p2048_p2 }
  0x2b   :  { %2056 = shalt.err (!%p2053_p4)
}
  0x2c   :  { %s2057_s23 = scalar_lea.vmem %s88_s30, 2048  ;;  %p2062_p6 = scmp.lt.s32.totalorder %s88_s30, %s88_s30 }
  0x2d   :  { %p2058_p5 = scmp.ne.s32.totalorder %s88_s30, %s2057_s23  ;;  %p2063_p7 = scmp.lt.s32.totalorder %s2057_s23, %s2057_s23 }
  0x2f   :  { %p2064_p8 = por %p2063_p7, %p2062_p6 }
  0x31   :  { %p2065_p9 = pnand %p2064_p8, %p2058_p5 }
  0x33   :  { %2068 = shalt.err (!%p2065_p9)
}
  0x34   :  { %s2194_s3 = smov 128   ;;  %s2195_s24 = smov 8  }
  0x35   :  { %93 = dma.hbm_to_vmem [thread:$0]  %s2617_s5, 2048, %s88_s30, [#allocation14], %s2194_s3, %s2194_s3, %s2195_s24  }
  0x36   :  { %s2196_s27 = smov [#allocation4]   ;;  %s2197_s1 = smov [#allocation9]  }
  0x37   :  { %s27_s28 = sshll.u32 %s2196_s27, 4  ;;  %s51_s22 = sshll.u32 %s2197_s1, 4  ;;  %s28_s28 = int_to_ptr.vmem [resolvable:$true] %s27_s28  ;;  %s52_s22 = int_to_ptr.vmem [resolvable:$true] %s51_s22 }
  0x38   :  { %s2069_s14 = scalar_lea.hbm %s2612_s0, 256 }
  0x39   :  { %p2070_p10 = scmp.ne.s32.totalorder %s2612_s0, %s2069_s14  ;;  %p2073_p11 = scmp.lt.u32.totalorder %s2069_s14, %s2612_s0 }
  0x3b   :  { %p2075_p12 = pnand %p2073_p11, %p2070_p10 }
  0x3d   :  { %2078 = shalt.err (!%p2075_p12)
}
  0x3e   :  { %s2079_s5 = scalar_lea.vmem %s28_s28, 256  ;;  %p2084_p0 = scmp.lt.s32.totalorder %s28_s28, %s28_s28 }
  0x3f   :  { %p2080_p13 = scmp.ne.s32.totalorder %s28_s28, %s2079_s5  ;;  %p2085_p1 = scmp.lt.s32.totalorder %s2079_s5, %s2079_s5 }
  0x41   :  { %p2086_p2 = por %p2085_p1, %p2084_p0 }
  0x43   :  { %p2087_p3 = pnand %p2086_p2, %p2080_p13 }
  0x45   :  { %2090 = shalt.err (!%p2087_p3)
}
  0x46   :  { %33 = dma.hbm_to_vmem [thread:$0]  %s2612_s0, 256, %s28_s28, [#allocation5], %s2191_s15, %s2191_s15, %s2192_s16  }
  0x47   :  { %s2091_s26 = scalar_lea.hbm %s2614_s2, 768 }
  0x48   :  { %p2092_p4 = scmp.ne.s32.totalorder %s2614_s2, %s2091_s26  ;;  %p2095_p5 = scmp.lt.u32.totalorder %s2091_s26, %s2614_s2 }
  0x4a   :  { %p2097_p6 = pnand %p2095_p5, %p2092_p4 }
  0x4c   :  { %2100 = shalt.err (!%p2097_p6)
}
  0x4d   :  { %s2101_s14 = scalar_lea.vmem %s52_s22, 768  ;;  %p2106_p8 = scmp.lt.s32.totalorder %s52_s22, %s52_s22 }
  0x4e   :  { %p2102_p7 = scmp.ne.s32.totalorder %s52_s22, %s2101_s14  ;;  %p2107_p9 = scmp.lt.s32.totalorder %s2101_s14, %s2101_s14 }
  0x50   :  { %p2108_p10 = por %p2107_p9, %p2106_p8 }
  0x52   :  { %p2109_p11 = pnand %p2108_p10, %p2102_p7 }
  0x54   :  { %2112 = shalt.err (!%p2109_p11)
}
  0x55   :  { %57 = dma.hbm_to_vmem [thread:$0]  %s2614_s2, 768, %s52_s22, [#allocation8], %s2191_s15, %s2191_s15, %s2192_s16  }
  0x56   :  { %s2198_s17 = smov [#allocation12]   ;;  %s2199_s19 = smov [#allocation15]  }
  0x57   :  { %s75_s18 = sshll.u32 %s2198_s17, 4  ;;  %s99_s20 = sshll.u32 %s2199_s19, 4  ;;  %s76_s18 = int_to_ptr.vmem [resolvable:$true] %s75_s18  ;;  %s100_s20 = int_to_ptr.vmem [resolvable:$true] %s99_s20 }
  0x58   :  { %s2113_s21 = scalar_lea.hbm %s2616_s4, 1536 }
  0x59   :  { %p2114_p12 = scmp.ne.s32.totalorder %s2616_s4, %s2113_s21  ;;  %p2117_p13 = scmp.lt.u32.totalorder %s2113_s21, %s2616_s4 }
  0x5b   :  { %p2119_p0 = pnand %p2117_p13, %p2114_p12 }
  0x5d   :  { %2122 = shalt.err (!%p2119_p0)
}
  0x5e   :  { %s2123_s2 = scalar_lea.vmem %s76_s18, 1536  ;;  %p2128_p2 = scmp.lt.s32.totalorder %s76_s18, %s76_s18 }
  0x5f   :  { %p2124_p1 = scmp.ne.s32.totalorder %s76_s18, %s2123_s2  ;;  %p2129_p3 = scmp.lt.s32.totalorder %s2123_s2, %s2123_s2 }
  0x61   :  { %p2130_p4 = por %p2129_p3, %p2128_p2 }
  0x63   :  { %p2131_p5 = pnand %p2130_p4, %p2124_p1 }
  0x65   :  { %2134 = shalt.err (!%p2131_p5)
}
  0x66   :  { %81 = dma.hbm_to_vmem [thread:$0]  %s2616_s4, 1536, %s76_s18, [#allocation11], %s2191_s15, %s2191_s15, %s2192_s16  }
  0x67   :  { %s2135_s14 = scalar_lea.hbm %s2618_s6, 1024 }
  0x68   :  { %p2136_p6 = scmp.ne.s32.totalorder %s2618_s6, %s2135_s14  ;;  %p2139_p7 = scmp.lt.u32.totalorder %s2135_s14, %s2618_s6 }
  0x6a   :  { %p2141_p8 = pnand %p2139_p7, %p2136_p6 }
  0x6c   :  { %2144 = shalt.err (!%p2141_p8)
}
  0x6d   :  { %s2145_s5 = scalar_lea.vmem %s100_s20, 1024  ;;  %p2150_p10 = scmp.lt.s32.totalorder %s100_s20, %s100_s20 }
  0x6e   :  { %p2146_p9 = scmp.ne.s32.totalorder %s100_s20, %s2145_s5  ;;  %p2151_p11 = scmp.lt.s32.totalorder %s2145_s5, %s2145_s5 }
  0x70   :  { %p2152_p12 = por %p2151_p11, %p2150_p10 }
  0x72   :  { %p2153_p13 = pnand %p2152_p12, %p2146_p9 }
  0x74   :  { %2156 = shalt.err (!%p2153_p13)
}
  0x75   :  { %105 = dma.hbm_to_vmem [thread:$0]  %s2618_s6, 1024, %s100_s20, [#allocation14], %s2194_s3, %s2194_s3, %s2195_s24  }
  0x76   :  { %2179 = dma.done.wait [#allocation5], 256  }
  0x77   :  { %2180 = vsyncadd [#allocation5], 4294967040 }
  0x78   :  { %2181 = dma.done.wait [#allocation8], 1024  }
  0x79   :  { %2182 = vsyncadd [#allocation8], 4294966272 }
  0x7a   :  { %2183 = dma.done.wait [#allocation11], 1792  }
  0x7b   :  { %2184 = vsyncadd [#allocation11], 4294965504 }
  0x7c   :  { %2185 = dma.done.wait [#allocation14], 3072  }
  0x7d   :  { %2186 = vsyncadd [#allocation14], 4294964224  ;;  %vm138_vm0 = vcmask 253952   ;;  %vm141_vm1 = vcmask 254977   ;;  %v2200_v0 = vmov 0   ;;  %v2201_v1 = vmov 0.0|0.0  }
  0x7e   :  { %139 = vst.msk [vmem:[#allocation2] sm:$0x1] %vm138_vm0, %v2200_v0  ;;  %140 = vst.msk [vmem:[#allocation2 + $0xc] sm:$0x1] %vm138_vm0, %v2200_v0  ;;  %1871 = vmatprep.subr.bf16.mxu1 %v2201_v1  ;;  %vm152_vm2 = vcmask 1040384   ;;  %v1975_v2 = vld [vmem:[#allocation9 + $0x10] sm:$0xff]  }
  0x7f   :  { %142 = vst.msk [vmem:[#allocation2 + $0x8] sm:$0x2] %vm141_vm1, %v2200_v0  ;;  %143 = vst.msk [vmem:[#allocation2 + $0x14] sm:$0x2] %vm141_vm1, %v2200_v0  ;;  %vm153_vm3 = vcmask 1044484   ;;  %v1976_v3 = vld [vmem:[#allocation9 + $0x18] sm:$0xff]   ;;  %1695 = vmatprep.subr.bf16.mxu0 %v1975_v2 }
  0x80   :  { %vm171_vm4 = vcmask 257025   ;;  %v144_v4 = vld [vmem:[#allocation4] sm:$0xf]  ;;  %v145_v5 = vld [vmem:[#allocation4 + $0x4] sm:$0xf]  ;;  %1696 = vmatpush3.bf16.msra.mxu0 %v1975_v2  ;;  %vm2385_vm5 = vmor %vm152_vm2, %vm153_vm3  ;;  %vm173_vm6 = vcmask 257024  }
  0x81   :  { %v146_v6 = vld [vmem:[#allocation4 + $0x8] sm:$0xf]  ;;  %v147_v7 = vld [vmem:[#allocation4 + $0xc] sm:$0xf]  ;;  %v155_v9 = vrot.slane %v144_v4, 7  ;;  %v157_v10 = vrot.slane %v145_v5, 7  ;;  %1697 = vmatprep.subr.bf16.mxu0 %v1976_v3 }
  0x82   :  { %v160_v11 = vrot.slane %v146_v6, 7  ;;  %v162_v12 = vrot.slane %v147_v7, 7  ;;  %v2389_v13 = vld [vmem:[#allocation9] sm:$0xff]   ;;  %v493_v21 = vld [vmem:[#allocation13 + $0x8] sm:$0xff]  ;;  %v494_v22 = vld [vmem:[#allocation13 + $0x10] sm:$0xff]  ;;  %vm197_vm7 = vcmask 1042432  }
  0x83   :  { %v156_v14 = vrot.slane %v155_v9, 4  ;;  %v159_v15 = vrot.slane %v157_v10, 4  ;;  %172 = vst.msk [vmem:[#allocation2] sm:$0xe] %vm171_vm4, %v155_v9  ;;  %v492_v20 = vld [vmem:[#allocation13] sm:$0xff]  ;;  %vm198_vm8 = vcmask 1046532  }
  0x84   :  { %v161_v16 = vrot.slane %v160_v11, 4  ;;  %176 = vst.msk [vmem:[#allocation2 + $0xc] sm:$0xe] %vm171_vm4, %v160_v11  ;;  %v164_v17 = vrot.slane %v162_v12, 4  ;;  %1698 = vmatpush3.bf16.msra.mxu0 %v1976_v3  ;;  %v2400_v23 = vpack.c.bf16 %v493_v21, %v492_v20  ;;  %v495_v24 = vld [vmem:[#allocation13 + $0x18] sm:$0xff]  ;;  %v496_v25 = vld [vmem:[#allocation13 + $0x20] sm:$0xff]  ;;  %vm2406_vm9 = vmor %vm197_vm7, %vm198_vm8 }
  0x85   :  { %v158_v18 = vsel %vm2385_vm5, %v156_v14, %v157_v10  ;;  %175 = vst.msk [vmem:[#allocation2 + $0x8] sm:$0x1] %vm138_vm0, %v159_v15  ;;  %1703 = vmatprep.subr.bf16.mxu0 %v2389_v13  ;;  %v2403_v26 = vpack.c.bf16 %v495_v24, %v494_v22  ;;  %v497_v29 = vld [vmem:[#allocation13 + $0x28] sm:$0xff]  ;;  %vm376_vm10 = vcmask 1041408   ;;  %vm377_vm11 = vcmask 1045508   ;;  %v1979_v60 = vld [vmem:[#allocation9 + $0x20] sm:$0xff]  }
  0x86   :  { %v163_v19 = vsel %vm2385_vm5, %v161_v16, %v162_v12  ;;  %174 = vst.msk [vmem:[#allocation2 + $0x4] sm:$0xf] %vm173_vm6, %v158_v18  ;;  %1873 = vmatpush3.bf16.msra.mxu1 %v2400_v23  ;;  %v1878_v37 = vpack.c.bf16 %v497_v29, %v496_v25  ;;  %vm237_vm12 = vcmask 261120   ;;  %v1978_v53 = vld [vmem:[#allocation9 + $0x8] sm:$0xff]   ;;  %vm2421_vm13 = vmor %vm376_vm10, %vm377_vm11  ;;  %v499_v14 = vld [vmem:[#allocation13 + $0x38] sm:$0xff]  ;;  %vm2202_vm14 = vmmov 0  }
  0x87   :  { %177 = vst.msk [vmem:[#allocation2 + $0x10] sm:$0xf] %vm173_vm6, %v163_v19  ;;  %1874 = vmatprep.subr.bf16.mxu1 %v2201_v1  ;;  %v1980_v4 = vld [vmem:[#allocation9 + $0x28] sm:$0xff]   ;;  %v500_v16 = vld [vmem:[#allocation13 + $0x40] sm:$0xff]  ;;  %v502_v19 = vld [vmem:[#allocation13 + $0x50] sm:$0xff]  ;;  %vm707_vm15 = vcmask 516096  }
  0x88   :  { %178 = vst.msk [vmem:[#allocation2 + $0x14] sm:$0x1] %vm138_vm0, %v164_v17  ;;  %v501_v17 = vld [vmem:[#allocation13 + $0x48] sm:$0xff]  ;;  %v503_v20 = vld [vmem:[#allocation13 + $0x58] sm:$0xff]  ;;  %v504_v22 = vld [vmem:[#allocation13 + $0x60] sm:$0xff]  ;;  %vm778_vm4 = vcmask 519168  }
  0x89   :  { %v1884_v18 = vpack.c.bf16 %v501_v17, %v500_v16  ;;  %v1887_v21 = vpack.c.bf16 %v503_v20, %v502_v19  ;;  %v506_v24 = vld [vmem:[#allocation13 + $0x70] sm:$0xff]  ;;  %vm708_vm0 = vsmask.f32 256  ;;  %vm716_vm2 = vsmask.f32 7938  ;;  %v1984_v16 = vld [vmem:[#allocation12 + $0x38] sm:$0xff]  }
  0x8a   :  { %v187_v27 = vld [vmem:[#allocation2] sm:$0xe]  ;;  %1876 = vmatpush3.bf16.msra.mxu1 %v2403_v26  ;;  %vm2466_vm1 = vmand %vm707_vm15, %vm708_vm0  ;;  %v2475_v17 = vld [vmem:[#allocation12] sm:$0xff]   ;;  %vm736_vm5 = vsmask.f32 4368 }
  0x8b   :  { %v189_v28 = vld [vmem:[#allocation2 + $0xc] sm:$0xe]  ;;  %v1540_v32 = vrot.slane %v187_v27, 9  ;;  %v368_v36 = vld [vmem:[#allocation2] sm:$0xc]  ;;  %1877 = vmatprep.subr.bf16.mxu1 %v2201_v1  ;;  %v2203_v27 = vmov 0.0   ;;  %vm717_vm3 = vmand %vm707_vm15, %vm716_vm2 }
  0x8c   :  { %v188_v30 = vld [vmem:[#allocation2 + $0x8] sm:$0x1]  ;;  %v1541_v33 = vrot.slane %v189_v28, 9  ;;  %v179_v44 = vld [vmem:[#allocation2] sm:$0xf]  ;;  %v1554_v50 = vrot.slane %v368_v36, 10  ;;  %1751 = vmatprep.mubr.msk.f32.mxu1 %vm2202_vm14, %v2203_v27  ;;  %vm2491_vm6 = vmand %vm778_vm4, %vm716_vm2 }
  0x8d   :  { %v180_v34 = vld [vmem:[#allocation2 + $0x4] sm:$0xf]  ;;  %v205_v39 = vrot.slane %v188_v30, 5  ;;  %v369_v45 = vld [vmem:[#allocation2 + $0x8] sm:$0x3]  ;;  %vm737_vm7 = vmor %vm708_vm0, %vm736_vm5 }
  0x8e   :  { %v182_v35 = vld [vmem:[#allocation2 + $0x10] sm:$0xf]  ;;  %v202_v38 = vrot.slane %v180_v34, 5  ;;  %v381_v40 = vrot.slane %v180_v34, 6  ;;  %1879 = vmatpush3.bf16.msra.mxu1 %v1878_v37  ;;  %v384_v56 = vrot.slane %v369_v45, 6  ;;  %v1548_v59 = vcombine.low %v179_v44, %v180_v34 }
  0x8f   :  { %v190_v41 = vld [vmem:[#allocation2 + $0x14] sm:$0x1]  ;;  %v209_v42 = vrot.slane %v182_v35, 5  ;;  %1880 = vmatprep.subr.bf16.mxu1 %v2201_v1  ;;  %v181_v61 = vld [vmem:[#allocation2 + $0xc] sm:$0xf]  ;;  %v388_v3 = vrot.slane %v182_v35, 6 }
  0x90   :  { %v212_v43 = vrot.slane %v190_v41, 5  ;;  %v203_v46 = vsel %vm2406_vm9, %v1540_v32, %v202_v38  ;;  %v204_v47 = vrot.slane %v202_v38, 4  ;;  %v383_v55 = vrot.slane %v381_v40, 4  ;;  %v370_v5 = vld [vmem:[#allocation2 + $0xc] sm:$0xc] }
  0x91   :  { %v210_v48 = vsel %vm2406_vm9, %v1541_v33, %v209_v42  ;;  %v211_v49 = vrot.slane %v209_v42, 4  ;;  %v382_v62 = vsel %vm2421_vm13, %v1554_v50, %v381_v40  ;;  %v1549_v0 = vcombine.low %v181_v61, %v182_v35  ;;  %v371_v6 = vld [vmem:[#allocation2 + $0x14] sm:$0x3] }
  0x92   :  { %v206_v51 = vsel %vm2406_vm9, %v204_v47, %v205_v39  ;;  %v385_v63 = vsel %vm2421_vm13, %v383_v55, %v384_v56  ;;  %v1555_v7 = vrot.slane %v370_v5, 10  ;;  %v390_v8 = vrot.slane %v388_v3, 4 }
  0x93   :  { %v213_v52 = vsel %vm2406_vm9, %v211_v49, %v212_v43  ;;  %v1542_v57 = vcombine.low %v203_v46, %v206_v51  ;;  %v1556_v2 = vcombine.low %v382_v62, %v385_v63  ;;  %v391_v9 = vrot.slane %v371_v6, 6  ;;  %v713_v6 = vld [vmem:[#allocation3 + $0xc] sm:$0x1] }
  0x94   :  { %v1543_v58 = vcombine.low %v210_v48, %v213_v52  ;;  %v389_v10 = vsel %vm2421_vm13, %v1555_v7, %v388_v3  ;;  %v579_v43 = vlaneseq  ;;  %v718_v7 = vld [vmem:[#allocation3 + $0x8] sm:$0x1]  ;;  %vm809_vm8 = vsmask.f32 3328 }
  0x95   :  { %1699 = vmatprep.mubr.msk.bf16.mxu0 %vm237_vm12, %v1542_v57  ;;  %v392_v11 = vsel %vm2421_vm13, %v390_v8, %v391_v9  ;;  %v714_v9 = vsel %vm2466_vm1, 0, %v713_v6  ;;  %vm810_vm10 = vsmask.f32 7440  ;;  %vm899_vm13 = vcmask 523264  }
  0x96   :  { %1700 = vmatmul.mubr.msk.bf16.vlgmr.msra.gmra.mrb[0].mxu0 %vm237_vm12, %v1543_v58  ;;  %v1557_v12 = vcombine.low %v389_v10, %v392_v11  ;;  %v580_v44 = vshrl.u32 %v579_v43, 7  ;;  %v721_v10 = vld [vmem:[#allocation3 + $0x14] sm:$0x1]  ;;  %715 = vst [vmem:[#allocation3 + $0xc] sm:$0x1] %v714_v9  ;;  %v719_v11 = vsel %vm717_vm3, 0, %v718_v7  ;;  %vm2523_vm11 = vmor %vm809_vm8, %vm810_vm10 }
  0x97   :  { %1704 = vmatpush3.bf16.msra.mxu0 %v2389_v13  ;;  %1707 = vmatprep.mubr.msk.bf16.mxu0 %vm237_vm12, %v1548_v59  ;;  %v498_v13 = vld [vmem:[#allocation13 + $0x30] sm:$0xff]  ;;  %720 = vst [vmem:[#allocation3 + $0x8] sm:$0x1] %v719_v11 }
  0x98   :  { %1705 = vmatprep.subr.bf16.mxu0 %v1978_v53  ;;  %v1881_v15 = vpack.c.bf16 %v499_v14, %v498_v13  ;;  %v2460_v45 = vsub.s32 0, %v580_v44  ;;  %v1981_v13 = vld [vmem:[#allocation12 + $0x20] sm:$0xff]   ;;  %v1982_v14 = vld [vmem:[#allocation12 + $0x28] sm:$0xff]  }
  0x9a   :  { %1882 = vmatpush3.bf16.msra.mxu1 %v1881_v15 }
  0x9b   :  { %1706 = vmatpush3.bf16.msra.mxu0 %v1978_v53  ;;  %1883 = vmatprep.subr.bf16.mxu1 %v2201_v1 }
  0x9c   :  { %1711 = vmatprep.subr.bf16.mxu0 %v1979_v60 }
  0x9e   :  { %1885 = vmatpush3.bf16.msra.mxu1 %v1884_v18  ;;  %v785_v7 = vld [vmem:[#allocation3 + $0x8] sm:$0x1] }
  0x9f   :  { %1886 = vmatprep.subr.bf16.mxu1 %v2201_v1 }
  0xa2   :  { %1708 = vmatmul.mubr.msk.bf16.vlgmr.msra.gmra.mrb[0].mxu0 %vm237_vm12, %v1549_v0  ;;  %1888 = vmatpush3.bf16.msra.mxu1 %v1887_v21 }
  0xa3   :  { %1712 = vmatpush3.bf16.msra.mxu0 %v1979_v60  ;;  %1715 = vmatprep.mubr.msk.bf16.mxu0 %vm237_vm12, %v1556_v2 }
  0xa4   :  { %1713 = vmatprep.subr.bf16.mxu0 %v1980_v4  ;;  %1889 = vmatprep.subr.bf16.mxu1 %v2201_v1 }
  0xa7   :  { %1714 = vmatpush3.bf16.msra.mxu0 %v1980_v4  ;;  %v710_v4 = vld [vmem:[#allocation3] sm:$0x1] }
  0xa8   :  { %1895 = vmatprep.subr.bf16.mxu0 %v2201_v1  ;;  %v711_v8 = vsel %vm2466_vm1, 0, %v710_v4 }
  0xa9   :  { %712 = vst [vmem:[#allocation3] sm:$0x1] %v711_v8 }
  0xae   :  { %1716 = vmatmul.mubr.msk.bf16.vlgmr.msra.gmra.mrb[0].mxu0 %vm237_vm12, %v1557_v12  ;;  %v722_v12 = vsel %vm717_vm3, 0, %v721_v10 }
  0xaf   :  { %1897 = vmatpush3.bf16.msra.mxu0 %v2400_v23  ;;  %v505_v23 = vld [vmem:[#allocation13 + $0x68] sm:$0xff]  ;;  %1786 = vmatprep.mubr.msk.f32.mxu0 %vm2202_vm14, %v2203_v27  ;;  %723 = vst [vmem:[#allocation3 + $0x14] sm:$0x1] %v722_v12 }
  0xb0   :  { %1898 = vmatprep.subr.bf16.mxu0 %v2201_v1  ;;  %v1890_v25 = vpack.c.bf16 %v505_v23, %v504_v22 }
  0xb2   :  { %1891 = vmatpush3.bf16.msra.mxu1 %v1890_v25 }
  0xb3   :  { %1900 = vmatpush3.bf16.msra.mxu0 %v2403_v26  ;;  %v507_v26 = vld [vmem:[#allocation13 + $0x78] sm:$0xff]  ;;  %1892 = vmatprep.subr.bf16.mxu1 %v2201_v1 }
  0xb4   :  { %1901 = vmatprep.subr.bf16.mxu0 %v2201_v1  ;;  %v1893_v28 = vpack.c.bf16 %v507_v26, %v506_v24  ;;  %v1562_v24 = vld [vmem:[%s2619_s7] ss:$0 sm:$0xff] }
  0xb6   :  { %1894 = vmatpush3.bf16.msra.mxu1 %v1893_v28  ;;  %v792_v6 = vld [vmem:[#allocation3 + $0x14] sm:$0x1] }
  0xb7   :  { %1903 = vmatpush3.bf16.msra.mxu0 %v1878_v37  ;;  %1789 = vmatprep.subr.bf16.mxu1 %v1981_v13 }
  0xb8   :  { %1904 = vmatprep.subr.bf16.mxu0 %v2201_v1 }
  0xbb   :  { %1906 = vmatpush3.bf16.msra.mxu0 %v1881_v15  ;;  %v1983_v15 = vld [vmem:[#allocation12 + $0x30] sm:$0xff]  }
  0xbc   :  { %1907 = vmatprep.subr.bf16.mxu0 %v2201_v1 }
  0xbf   :  { %1909 = vmatpush3.bf16.msra.mxu0 %v1884_v18 }
  0xc0   :  { %1910 = vmatprep.subr.bf16.mxu0 %v2201_v1 }
  0xc3   :  { %1912 = vmatpush3.bf16.msra.mxu0 %v1887_v21 }
  0xc4   :  { %1913 = vmatprep.subr.bf16.mxu0 %v2201_v1 }
  0xc7   :  { %1915 = vmatpush3.bf16.msra.mxu0 %v1890_v25 }
  0xc8   :  { %1916 = vmatprep.subr.bf16.mxu0 %v2201_v1 }
  0xcb   :  { %1918 = vmatpush3.bf16.msra.mxu0 %v1893_v28 }
  0xcc   :  { %1919 = vmatprep.subr.bf16.mxu0 %v2201_v1 }
 0x181   :  { %v1717_v29 = vpop.f32.mrb[0].mxu0 }
 0x182   :  { %v456_v30 = vpop.f32.mrb[1].mxu0 }
 0x183   :  { %v1718_v32 = vpop.f32.mrb[2].mxu0 }
 0x184   :  { %v459_v33 = vpop.f32.mrb[3].mxu0 }
 0x185   :  { %v483_v34 = vadd.f32 %v459_v33, %v456_v30 }
 0x187   :  { %v484_v35 = vadd.f32 %v1717_v29, %v483_v34 }
 0x189   :  { %v485_v36 = vadd.f32 %v1718_v32, %v484_v35 }
 0x18b   :  { %v486_v37 = vrot.slane %v485_v36, 4 }
 0x18d   :  { %v487_v38 = vadd.f32 %v486_v37, %v485_v36 }
 0x18f   :  { %v488_v39 = vrot.slane %v487_v38, 2 }
 0x191   :  { %v489_v40 = vadd.f32 %v488_v39, %v487_v38 }
 0x193   :  { %v490_v41 = vrot.slane %v489_v40, 1 }
 0x195   :  { %v491_v42 = vadd.f32 %v490_v41, %v489_v40 }
 0x197   :  { %1752 = vmatmul.mubr.f32.vlgmr.msra.gmra.mrb[0].mxu1 %v491_v42 }
 0x198   :  { %1790 = vmatpush3.bf16.msra.mxu1 %v1981_v13 }
 0x199   :  { %1791 = vmatprep.subr.bf16.mxu1 %v1982_v14 }
 0x19c   :  { %1792 = vmatpush3.bf16.msra.mxu1 %v1982_v14 }
 0x19d   :  { %1793 = vmatprep.subr.bf16.mxu1 %v1983_v15 }
 0x1a0   :  { %1794 = vmatpush3.bf16.msra.mxu1 %v1983_v15 }
 0x1a1   :  { %1795 = vmatprep.subr.bf16.mxu1 %v1984_v16 }
 0x1a4   :  { %1796 = vmatpush3.bf16.msra.mxu1 %v1984_v16 }
 0x1a5   :  { %1801 = vmatprep.subr.bf16.mxu1 %v2475_v17 }
 0x26a   :  { %v574_v46 = vpop.f32.mrb[0].mxu1 }
 0x26b   :  { %v578_v47 = vmul.f32 0.001953125, %v574_v46  ;;  %v1753_v48 = vpop.f32.mrb[1].mxu1 }
 0x26d   :  { %v582_v49 = vrot.slane %v578_v47, %v2460_v45 }
 0x26f   :  { %v583_v50 = vsub.f32 %v456_v30, %v582_v49  ;;  %v584_v51 = vsub.f32 %v459_v33, %v582_v49  ;;  %v585_v52 = vsub.f32 %v1717_v29, %v582_v49  ;;  %v586_v53 = vsub.f32 %v1718_v32, %v582_v49  ;;  %v1563_v30 = vld [vmem:[%s2620_s8] ss:$0 sm:$0xff] }
 0x271   :  { %v587_v54 = vmul.f32 %v583_v50, %v583_v50  ;;  %v588_v55 = vmul.f32 %v584_v51, %v584_v51  ;;  %v589_v56 = vmul.f32 %v585_v52, %v585_v52  ;;  %v590_v58 = vmul.f32 %v586_v53, %v586_v53 }
 0x273   :  { %v591_v57 = vadd.f32 %v588_v55, %v587_v54 }
 0x275   :  { %v592_v59 = vadd.f32 %v591_v57, %v589_v56 }
 0x277   :  { %v593_v60 = vadd.f32 %v592_v59, %v590_v58  ;;  %v780_v59 = vld [vmem:[#allocation3] sm:$0xf] }
 0x279   :  { %v594_v61 = vrot.slane %v593_v60, 4 }
 0x27b   :  { %v595_v62 = vadd.f32 %v594_v61, %v593_v60 }
 0x27d   :  { %v596_v63 = vrot.slane %v595_v62, 2 }
 0x27f   :  { %v597_v0 = vadd.f32 %v596_v63, %v595_v62 }
 0x281   :  { %v598_v2 = vrot.slane %v597_v0, 1 }
 0x283   :  { %v599_v3 = vadd.f32 %v598_v2, %v597_v0 }
 0x285   :  { %1787 = vmatmul.mubr.f32.vlgmr.msra.gmra.mrb[4].mxu0 %v599_v3 }
 0x286   :  { %1841 = vmatprep.mubr.msk.f32.mxu0 %vm2202_vm14, %v2203_v27 }
 0x358   :  { %v666_v18 = vpop.f32.mrb[4].mxu0 }
 0x359   :  { %v670_v19 = vmul.f32 0.001953125, %v666_v18  ;;  %v1788_v20 = vpop.f32.mrb[5].mxu0 }
 0x35b   :  { %v671_v21 = vadd.f32 1e-05, %v670_v19 }
 0x35d   :  { %1999 = vrsqrt.f32 %v671_v21 }
 0x367   :  { %v2000_v22 = vpop.eup %1999 }
 0x368   :  { %v676_v23 = vrot.slane %v2000_v22, %v2460_v45 }
 0x36a   :  { %v679_v25 = vmul.f32 %v676_v23, %v585_v52  ;;  %v677_v26 = vmul.f32 %v676_v23, %v583_v50  ;;  %v680_v28 = vmul.f32 %v676_v23, %v586_v53  ;;  %v678_v29 = vmul.f32 %v676_v23, %v584_v51  ;;  %v788_v53 = vld [vmem:[#allocation3 + $0xc] sm:$0xf] }
 0x36c   :  { %v690_v32 = vmul.f32 %v1562_v24, %v679_v25  ;;  %v688_v33 = vmul.f32 %v1562_v24, %v677_v26  ;;  %v691_v34 = vmul.f32 %v1562_v24, %v680_v28  ;;  %v689_v35 = vmul.f32 %v1562_v24, %v678_v29 }
 0x36e   :  { %v701_v36 = vadd.f32 %v1563_v30, %v690_v32  ;;  %v699_v37 = vadd.f32 %v1563_v30, %v688_v33  ;;  %v702_v38 = vadd.f32 %v1563_v30, %v691_v34  ;;  %v700_v39 = vadd.f32 %v1563_v30, %v689_v35 }
 0x370   :  { %1396 = vrot.lane.b32.xlu1 %v701_v36, %s2191_s15  ;;  %v705_v40 = vmax.f32 %v701_v36, 0.0  ;;  %1392 = vrot.lane.b32.xlu0 %v699_v37, %s2191_s15  ;;  %v703_v41 = vmax.f32 %v699_v37, 0.0  ;;  %v706_v42 = vmax.f32 %v702_v38, 0.0  ;;  %v704_v43 = vmax.f32 %v700_v39, 0.0 }
 0x372   :  { %v1607_v44 = vpack.c.bf16 %v705_v40, %v705_v40  ;;  %v1605_v46 = vpack.c.bf16 %v703_v41, %v703_v41  ;;  %v1608_v47 = vpack.c.bf16 %v706_v42, %v706_v42  ;;  %v1606_v48 = vpack.c.bf16 %v704_v43, %v704_v43 }
 0x374   :  { %v756_v49 = vshrl.u32 %v1607_v44, 16  ;;  %v739_v50 = vshrl.u32 %v1605_v46, 16  ;;  %1398 = vrot.lane.b32.xlu1 %v702_v38, %s2191_s15  ;;  %1394 = vrot.lane.b32.xlu0 %v700_v39, %s2191_s15  ;;  %v764_v51 = vshrl.u32 %v1608_v47, 16  ;;  %v747_v52 = vshrl.u32 %v1606_v48, 16 }
 0x375   :  { %v759_v55 = vshll.u32 %v1607_v44, 16  ;;  %v742_v57 = vshll.u32 %v1605_v46, 16  ;;  %v767_v61 = vshll.u32 %v1608_v47, 16  ;;  %v750_v63 = vshll.u32 %v1606_v48, 16 }
 0x376   :  { %v758_v54 = vrot.slane %v756_v49, 7  ;;  %v741_v56 = vrot.slane %v739_v50, 7  ;;  %v766_v60 = vrot.slane %v764_v51, 7  ;;  %v749_v62 = vrot.slane %v747_v52, 7 }
 0x378   :  { %v761_v0 = vor.u32 %v759_v55, %v758_v54  ;;  %v762_v2 = vrot.slane %v758_v54, 4  ;;  %v744_v3 = vor.u32 %v742_v57, %v741_v56  ;;  %v745_v4 = vrot.slane %v741_v56, 4 }
 0x379   :  { %v769_v8 = vor.u32 %v767_v61, %v766_v60  ;;  %v771_v9 = vrot.slane %v766_v60, 4  ;;  %v752_v10 = vor.u32 %v750_v63, %v749_v62  ;;  %v754_v11 = vrot.slane %v749_v62, 4  ;;  %v1987_v62 = vld [vmem:[#allocation12 + $0x8] sm:$0xff]  }
 0x37a   :  { %v789_v12 = vsel %vm2491_vm6, %v761_v0, %v788_v53  ;;  %v781_v13 = vsel %vm2491_vm6, %v744_v3, %v780_v59  ;;  %v1988_v0 = vld [vmem:[#allocation12 + $0x10] sm:$0xff]   ;;  %v1989_v3 = vld [vmem:[#allocation12 + $0x18] sm:$0xff]  }
 0x37b   :  { %790 = vst [vmem:[#allocation3 + $0xc] sm:$0xf] %v789_v12  ;;  %782 = vst [vmem:[#allocation3] sm:$0xf] %v781_v13  ;;  %v793_v14 = vsel %vm2466_vm1, %v771_v9, %v792_v6  ;;  %v770_v15 = vsel %vm737_vm7, %v762_v2, %v769_v8  ;;  %v786_v16 = vsel %vm2466_vm1, %v754_v11, %v785_v7  ;;  %v1991_v7 = vld [vmem:[#allocation12 + $0x40] sm:$0xff]   ;;  %v1992_v12 = vld [vmem:[#allocation12 + $0x48] sm:$0xff]  }
 0x37c   :  { %v753_v18 = vsel %vm737_vm7, %v745_v4, %v752_v10  ;;  %794 = vst [vmem:[#allocation3 + $0x14] sm:$0x1] %v793_v14  ;;  %791 = vst.msk [vmem:[#allocation3 + $0x10] sm:$0xf] %vm778_vm4, %v770_v15  ;;  %v1993_v14 = vld [vmem:[#allocation12 + $0x50] sm:$0xff]  }
 0x37d   :  { %787 = vst [vmem:[#allocation3 + $0x8] sm:$0x1] %v786_v16  ;;  %784 = vst.msk [vmem:[#allocation3 + $0x4] sm:$0xf] %vm778_vm4, %v753_v18  ;;  %v1994_v16 = vld [vmem:[#allocation12 + $0x58] sm:$0xff]  }
 0x382   :  { %v795_v19 = vld [vmem:[#allocation3] sm:$0xf]  ;;  %v2507_v20 = vld [vmem:[#allocation3 + $0xc] sm:$0xf] }
 0x383   :  { %v813_v23 = vshrl.u32 %v795_v19, 16  ;;  %v816_v24 = vshll.u32 %v795_v19, 16  ;;  %v2513_v26 = vld [vmem:[#allocation3 + $0x10] sm:$0xf]  ;;  %v837_v28 = vshrl.u32 %v2507_v20, 16  ;;  %v840_v32 = vshll.u32 %v2507_v20, 16 }
 0x384   :  { %v2509_v21 = vld [vmem:[#allocation3 + $0x4] sm:$0xf]  ;;  %v807_v22 = vld [vmem:[#allocation3 + $0x8] sm:$0x1]  ;;  %v846_v33 = vshll.u32 %v2513_v26, 16  ;;  %v850_v42 = vshrl.u32 %v2513_v26, 16 }
 0x385   :  { %v822_v5 = vshll.u32 %v2509_v21, 16  ;;  %v826_v25 = vshrl.u32 %v2509_v21, 16  ;;  %v815_v29 = vrot.slane %v813_v23, 4  ;;  %v818_v30 = vrot.slane %v816_v24, 5  ;;  %v2518_v37 = vld [vmem:[#allocation3 + $0x14] sm:$0x1] }
 0x386   :  { %v832_v36 = vshll.u32 %v807_v22, 16  ;;  %v839_v38 = vrot.slane %v837_v28, 4  ;;  %v842_v40 = vrot.slane %v840_v32, 5  ;;  %v848_v41 = vrot.slane %v846_v33, 5  ;;  %v1044_v4 = vld [vmem:[#allocation3] sm:$0xe] }
 0x387   :  { %v824_v34 = vrot.slane %v822_v5, 5  ;;  %v828_v35 = vrot.slane %v826_v25, 4  ;;  %v819_v39 = vor.u32 %v818_v30, %v815_v29  ;;  %v852_v48 = vrot.slane %v850_v42, 4  ;;  %v1045_v18 = vld [vmem:[#allocation3 + $0xc] sm:$0xe]  ;;  %v1175_v5 = vld [vmem:[#allocation15] sm:$0xff] }
 0x388   :  { %v843_v47 = vor.u32 %v842_v40, %v839_v38  ;;  %v856_v49 = vshll.u32 %v2518_v37, 16  ;;  %v834_v51 = vrot.slane %v832_v36, 5  ;;  %v1576_v63 = vcombine.low %v795_v19, %v2509_v21  ;;  %v1176_v25 = vld [vmem:[#allocation15 + $0x8] sm:$0xff]  ;;  %v1177_v28 = vld [vmem:[#allocation15 + $0x10] sm:$0xff]  ;;  %v1178_v29 = vld [vmem:[#allocation15 + $0x18] sm:$0xff] }
 0x389   :  { %v829_v44 = vor.u32 %v828_v35, %v824_v34  ;;  %v820_v46 = vrot.slane %v819_v39, 4  ;;  %v853_v54 = vor.u32 %v852_v48, %v848_v41  ;;  %v1052_v2 = vrot.slane %v2509_v21, 5  ;;  %v1179_v32 = vld [vmem:[#allocation15 + $0x20] sm:$0xff]  ;;  %v1180_v33 = vld [vmem:[#allocation15 + $0x28] sm:$0xff]  ;;  %v1182_v35 = vld [vmem:[#allocation15 + $0x38] sm:$0xff] }
 0x38a   :  { %v844_v53 = vrot.slane %v843_v47, 4  ;;  %v858_v59 = vrot.slane %v856_v49, 5  ;;  %v1584_v8 = vrot.slane %v1044_v4, 9  ;;  %v1055_v9 = vrot.slane %v807_v22, 5  ;;  %v1996_v38 = vld [vmem:[#allocation10 + $0x8] sm:$0xff]   ;;  %v1997_v39 = vld [vmem:[#allocation7] sm:$0xff]  }
 0x38b   :  { %v830_v50 = vrot.slane %v829_v44, 4  ;;  %v825_v52 = vsel %vm2523_vm11, %v820_v46, %v824_v34  ;;  %v854_v58 = vrot.slane %v853_v54, 4  ;;  %v1054_v6 = vrot.slane %v1052_v2, 4  ;;  %v1181_v34 = vld [vmem:[#allocation15 + $0x30] sm:$0xff]  ;;  %v1998_v40 = vld [vmem:[#allocation7 + $0x8] sm:$0xff]  }
 0x38c   :  { %v849_v57 = vsel %vm2523_vm11, %v844_v53, %v848_v41  ;;  %v1053_v11 = vsel %vm2406_vm9, %v1584_v8, %v1052_v2  ;;  %v1059_v15 = vrot.slane %v2513_v26, 5  ;;  %v1062_v21 = vrot.slane %v2518_v37, 5  ;;  %v1995_v37 = vld [vmem:[#allocation10] sm:$0xff]  }
 0x38d   :  { %v835_v55 = vsel %vm2523_vm11, %v830_v50, %v834_v51  ;;  %v859_v60 = vsel %vm2523_vm11, %v854_v58, %v858_v59  ;;  %v1056_v10 = vsel %vm2406_vm9, %v1054_v6, %v1055_v9  ;;  %v1923_v30 = vpack.c.bf16 %v1178_v29, %v1177_v28 }
 0x38e   :  { %v1568_v56 = vcombine.low %v825_v52, %v835_v55  ;;  %v1569_v61 = vcombine.low %v849_v57, %v859_v60  ;;  %v1586_v13 = vcombine.low %v1053_v11, %v1056_v10  ;;  %v1061_v19 = vrot.slane %v1059_v15, 4  ;;  %v1598_v60 = vld [vmem:[%s2623_s11] ss:$0 sm:$0xff] }
 0x38f   :  { %v1926_v31 = vpack.c.bf16 %v1180_v33, %v1179_v32  ;;  %v1929_v36 = vpack.c.bf16 %v1182_v35, %v1181_v34 }
 0x390   :  { %1797 = vmatprep.mubr.msk.bf16.mxu1 %vm899_vm13, %v1568_v56  ;;  %v1063_v22 = vsel %vm2406_vm9, %v1061_v19, %v1062_v21 }
 0x391   :  { %1798 = vmatmul.mubr.msk.bf16.vlgmr.msra.gmra.mrb[4].mxu1 %vm899_vm13, %v1569_v61 }
 0x392   :  { %1802 = vmatpush3.bf16.msra.mxu1 %v2475_v17  ;;  %1809 = vmatprep.mubr.msk.bf16.mxu1 %vm899_vm13, %v1576_v63  ;;  %v1577_v17 = vcombine.low %v2507_v20, %v2513_v26  ;;  %v1585_v20 = vrot.slane %v1045_v18, 9  ;;  %v1920_v26 = vpack.c.bf16 %v1176_v25, %v1175_v5 }
 0x393   :  { %1803 = vmatprep.subr.bf16.mxu1 %v1987_v62 }
 0x394   :  { %v1060_v23 = vsel %vm2406_vm9, %v1585_v20, %v1059_v15  ;;  %1921 = vmatpush3.bf16.msra.mxu0 %v1920_v26 }
 0x395   :  { %v1587_v24 = vcombine.low %v1060_v23, %v1063_v22  ;;  %1922 = vmatprep.subr.bf16.mxu0 %v2201_v1 }
 0x396   :  { %1804 = vmatpush3.bf16.msra.mxu1 %v1987_v62 }
 0x397   :  { %1805 = vmatprep.subr.bf16.mxu1 %v1988_v0 }
 0x398   :  { %1924 = vmatpush3.bf16.msra.mxu0 %v1923_v30 }
 0x399   :  { %1925 = vmatprep.subr.bf16.mxu0 %v2201_v1 }
 0x39a   :  { %1806 = vmatpush3.bf16.msra.mxu1 %v1988_v0 }
 0x39b   :  { %1807 = vmatprep.subr.bf16.mxu1 %v1989_v3 }
 0x39c   :  { %1927 = vmatpush3.bf16.msra.mxu0 %v1926_v31 }
 0x39d   :  { %1928 = vmatprep.subr.bf16.mxu0 %v2201_v1 }
 0x39e   :  { %1808 = vmatpush3.bf16.msra.mxu1 %v1989_v3 }
 0x39f   :  { %1813 = vmatprep.subr.bf16.mxu1 %v1991_v7 }
 0x3a0   :  { %1930 = vmatpush3.bf16.msra.mxu0 %v1929_v36 }
 0x3a1   :  { %1810 = vmatmul.mubr.msk.bf16.vlgmr.msra.gmra.mrb[4].mxu1 %vm899_vm13, %v1577_v17  ;;  %1931 = vmatprep.subr.bf16.mxu0 %v2201_v1 }
 0x3a2   :  { %1814 = vmatpush3.bf16.msra.mxu1 %v1991_v7  ;;  %1821 = vmatprep.mubr.msk.bf16.mxu1 %vm899_vm13, %v1586_v13 }
 0x3a3   :  { %1815 = vmatprep.subr.bf16.mxu1 %v1992_v12 }
 0x3a6   :  { %1816 = vmatpush3.bf16.msra.mxu1 %v1992_v12 }
 0x3a7   :  { %1817 = vmatprep.subr.bf16.mxu1 %v1993_v14 }
 0x3aa   :  { %1818 = vmatpush3.bf16.msra.mxu1 %v1993_v14 }
 0x3ab   :  { %1819 = vmatprep.subr.bf16.mxu1 %v1994_v16 }
 0x3ae   :  { %1820 = vmatpush3.bf16.msra.mxu1 %v1994_v16 }
 0x3af   :  { %1863 = vmatprep.subr.bf16.mxu1 %v1995_v37 }
 0x3b1   :  { %1822 = vmatmul.mubr.msk.bf16.vlgmr.msra.gmra.mrb[4].mxu1 %vm899_vm13, %v1587_v24 }
 0x3b2   :  { %1867 = vmatprep.mubr.msk.bf16.mxu1 %vm237_vm12, %v1997_v39  ;;  %1864 = vmatpush3.bf16.msra.mxu1 %v1995_v37  ;;  %v1596_v39 = vld [vmem:[%s2621_s9] ss:$0 sm:$0xff]  ;;  %s2204_s9 = smov [#allocation16]  }
 0x3b3   :  { %1865 = vmatprep.subr.bf16.mxu1 %v1996_v38  ;;  %s1525_s25 = sshll.u32 %s2204_s9, 4  ;;  %s1526_s25 = int_to_ptr.vmem [resolvable:$true] %s1525_s25 }
 0x3b4   :  { %p2162_p1 = scmp.lt.s32.totalorder %s1526_s25, %s1526_s25 }
 0x3b6   :  { %1866 = vmatpush3.bf16.msra.mxu1 %v1996_v38 }
 0x3b9   :  { %1868 = vmatmul.mubr.msk.bf16.vlgmr.msra.gmra.mrb[8].mxu1 %vm237_vm12, %v1998_v40 }
 0x3e2   :  { %v1397_v34 = vpop.permute.xlu1 %1396 }
 0x3e6   :  { %v1399_v37 = vpop.permute.xlu1 %1398 }
 0x484   :  { %v1823_v41 = vpop.f32.mrb[4].mxu1 }
 0x485   :  { %v1143_v42 = vpop.f32.mrb[5].mxu1  ;;  %v1165_v49 = vsel %vm899_vm13, %v1823_v41, 0.0 }
 0x486   :  { %v1824_v43 = vpop.f32.mrb[6].mxu1  ;;  %v1162_v46 = vsel %vm899_vm13, %v1143_v42, 0.0 }
 0x487   :  { %v1146_v44 = vpop.f32.mrb[7].mxu1  ;;  %v1167_v51 = vsel %vm899_vm13, %v1824_v43, 0.0 }
 0x488   :  { %v1163_v47 = vsel %vm899_vm13, %v1146_v44, 0.0 }
 0x489   :  { %v1164_v48 = vadd.f32 %v1163_v47, %v1162_v46 }
 0x48b   :  { %v1166_v50 = vadd.f32 %v1165_v49, %v1164_v48 }
 0x48c   :  { %v1869_v59 = vpop.f32.mrb[8].mxu1 }
 0x48d   :  { %v1168_v52 = vadd.f32 %v1167_v51, %v1166_v50  ;;  %v1481_v61 = vpop.f32.mrb[9].mxu1  ;;  %v1490_v2 = vadd.f32 %v1869_v59, %v1598_v60 }
 0x48e   :  { %v1482_v62 = vadd.f32 %v1598_v60, %v1481_v61  ;;  %v1870_v63 = vpop.f32.mrb[10].mxu1 }
 0x48f   :  { %v1169_v53 = vrot.slane %v1168_v52, 4  ;;  %v1484_v0 = vpop.f32.mrb[11].mxu1  ;;  %v1493_v3 = vadd.f32 %v1870_v63, %v1598_v60 }
 0x490   :  { %1500 = vrot.lane.b32.xlu0 %v1482_v62, %s2191_s15 }
 0x491   :  { %v1170_v54 = vadd.f32 %v1169_v53, %v1168_v52 }
 0x493   :  { %v1171_v55 = vrot.slane %v1170_v54, 2 }
 0x494   :  { %1504 = vrot.lane.b32.xlu0 %v1490_v2, %s2191_s15 }
 0x495   :  { %v1172_v56 = vadd.f32 %v1171_v55, %v1170_v54 }
 0x497   :  { %v1173_v57 = vrot.slane %v1172_v56, 1 }
 0x499   :  { %v1174_v58 = vadd.f32 %v1173_v57, %v1172_v56 }
 0x49b   :  { %1842 = vmatmul.mubr.msk.f32.vlgmr.msra.gmra.mrb[6].mxu0 %vm899_vm13, %v1174_v58 }
 0x49c   :  { %1933 = vmatpush3.bf16.msra.mxu0 %v1920_v26  ;;  %1860 = vmatprep.mubr.msk.f32.mxu0 %vm2202_vm14, %v2203_v27  ;;  %v1485_v27 = vadd.f32 %v1598_v60, %v1484_v0 }
 0x49d   :  { %1934 = vmatprep.subr.bf16.mxu0 %v2201_v1 }
 0x49e   :  { %1502 = vrot.lane.b32.xlu1 %v1485_v27, %s2191_s15 }
 0x4a0   :  { %1936 = vmatpush3.bf16.msra.mxu0 %v1923_v30 }
 0x4a1   :  { %1937 = vmatprep.subr.bf16.mxu0 %v2201_v1 }
 0x4a2   :  { %1506 = vrot.lane.b32.xlu1 %v1493_v3, %s2191_s15 }
 0x4a4   :  { %1939 = vmatpush3.bf16.msra.mxu0 %v1926_v31  ;;  %v1393_v31 = vpop.permute.xlu0 %1392 }
 0x4a5   :  { %1940 = vmatprep.subr.bf16.mxu0 %v2201_v1 }
 0x4a8   :  { %1942 = vmatpush3.bf16.msra.mxu0 %v1929_v36  ;;  %v1395_v38 = vpop.permute.xlu0 %1394 }
 0x510   :  { %v1503_v50 = vpop.permute.xlu1 %1502 }
 0x514   :  { %v1507_v63 = vpop.permute.xlu1 %1506 }
 0x56e   :  { %v1252_v1 = vpop.f32.mrb[6].mxu0 }
 0x56f   :  { %v1256_v4 = vmul.f32 0.001953125, %v1252_v1  ;;  %v1843_v6 = vpop.f32.mrb[7].mxu0 }
 0x571   :  { %v1260_v7 = vrot.slane %v1256_v4, %v2460_v45 }
 0x573   :  { %v1261_v8 = vsub.f32 %v1143_v42, %v1260_v7  ;;  %v1262_v9 = vsub.f32 %v1146_v44, %v1260_v7  ;;  %v1263_v10 = vsub.f32 %v1823_v41, %v1260_v7  ;;  %v1264_v17 = vsub.f32 %v1824_v43, %v1260_v7  ;;  %v1597_v44 = vld [vmem:[%s2622_s10] ss:$0 sm:$0xff]  ;;  %s2157_s10 = scalar_lea.vmem %s1526_s25, 512 }
 0x574   :  { %p2158_p0 = scmp.ne.s32.totalorder %s1526_s25, %s2157_s10  ;;  %p2163_p2 = scmp.lt.s32.totalorder %s2157_s10, %s2157_s10 }
 0x575   :  { %v1265_v11 = vmul.f32 %v1261_v8, %v1261_v8  ;;  %v1266_v12 = vmul.f32 %v1262_v9, %v1262_v9  ;;  %v1267_v13 = vmul.f32 %v1263_v10, %v1263_v10  ;;  %v1268_v14 = vmul.f32 %v1264_v17, %v1264_v17 }
 0x576   :  { %p2164_p3 = por %p2163_p2, %p2162_p1 }
 0x577   :  { %v1269_v15 = vsel %vm899_vm13, %v1265_v11, 0.0  ;;  %v1270_v16 = vsel %vm899_vm13, %v1266_v12, 0.0  ;;  %v1272_v19 = vsel %vm899_vm13, %v1267_v13, 0.0  ;;  %v1274_v21 = vsel %vm899_vm13, %v1268_v14, 0.0 }
 0x578   :  { %v1271_v18 = vadd.f32 %v1270_v16, %v1269_v15  ;;  %p2165_p4 = pnand %p2164_p3, %p2158_p0 }
 0x57a   :  { %v1273_v20 = vadd.f32 %v1272_v19, %v1271_v18 }
 0x57c   :  { %v1275_v22 = vadd.f32 %v1274_v21, %v1273_v20 }
 0x57e   :  { %v1276_v23 = vrot.slane %v1275_v22, 4 }
 0x580   :  { %v1277_v24 = vadd.f32 %v1276_v23, %v1275_v22 }
 0x582   :  { %v1278_v5 = vrot.slane %v1277_v24, 2 }
 0x584   :  { %v1279_v25 = vadd.f32 %v1278_v5, %v1277_v24 }
 0x586   :  { %v1280_v26 = vrot.slane %v1279_v25, 1 }
 0x588   :  { %v1281_v28 = vadd.f32 %v1280_v26, %v1279_v25 }
 0x58a   :  { %1861 = vmatmul.mubr.msk.f32.vlgmr.msra.gmra.mrb[8].mxu0 %vm899_vm13, %v1281_v28 }
 0x65d   :  { %v1351_v29 = vpop.f32.mrb[8].mxu0 }
 0x65e   :  { %v1355_v30 = vmul.f32 0.001953125, %v1351_v29  ;;  %v1862_v32 = vpop.f32.mrb[9].mxu0 }
 0x660   :  { %v1356_v33 = vadd.f32 1e-05, %v1355_v30 }
 0x662   :  { %2001 = vrsqrt.f32 %v1356_v33 }
 0x66c   :  { %v2002_v35 = vpop.eup %2001 }
 0x66d   :  { %v1361_v36 = vrot.slane %v2002_v35, %v2460_v45  ;;  %v1501_v45 = vpop.permute.xlu0 %1500 }
 0x66f   :  { %v1363_v40 = vmul.f32 %v1361_v36, %v1262_v9  ;;  %v1362_v41 = vmul.f32 %v1361_v36, %v1261_v8  ;;  %v1365_v42 = vmul.f32 %v1361_v36, %v1264_v17  ;;  %v1364_v43 = vmul.f32 %v1361_v36, %v1263_v10 }
 0x671   :  { %v1374_v46 = vmul.f32 %v1596_v39, %v1363_v40  ;;  %v1373_v47 = vmul.f32 %v1596_v39, %v1362_v41  ;;  %v1376_v48 = vmul.f32 %v1596_v39, %v1365_v42  ;;  %v1375_v49 = vmul.f32 %v1596_v39, %v1364_v43  ;;  %v1505_v0 = vpop.permute.xlu0 %1504 }
 0x673   :  { %v1385_v51 = vadd.f32 %v1597_v44, %v1374_v46  ;;  %v1384_v52 = vadd.f32 %v1597_v44, %v1373_v47  ;;  %v1387_v53 = vadd.f32 %v1597_v44, %v1376_v48  ;;  %v1386_v54 = vadd.f32 %v1597_v44, %v1375_v49 }
 0x675   :  { %v1405_v55 = vadd.f32 %v1395_v38, %v1385_v51  ;;  %v1404_v56 = vadd.f32 %v1393_v31, %v1384_v52  ;;  %v1407_v57 = vadd.f32 %v1399_v37, %v1387_v53  ;;  %v1406_v58 = vadd.f32 %v1397_v34, %v1386_v54 }
 0x677   :  { %v1409_v59 = vmax.f32 %v1405_v55, 0.0  ;;  %v1408_v60 = vmax.f32 %v1404_v56, 0.0  ;;  %v1411_v61 = vmax.f32 %v1407_v57, 0.0  ;;  %v1410_v62 = vmax.f32 %v1406_v58, 0.0 }
 0x679   :  { %v1513_v2 = vsel %vm899_vm13, %v1409_v59, %v1503_v50  ;;  %v1512_v27 = vsel %vm899_vm13, %v1408_v60, %v1501_v45  ;;  %v1515_v3 = vsel %vm899_vm13, %v1411_v61, %v1507_v63  ;;  %v1514_v1 = vsel %vm899_vm13, %v1410_v62, %v1505_v0 }
 0x67a   :  { %1517 = vst [vmem:[#allocation16 + $0x8] sm:$0xff] %v1513_v2  ;;  %1516 = vst [vmem:[#allocation16] sm:$0xff] %v1512_v27 }
 0x67b   :  { %1519 = vst [vmem:[#allocation16 + $0x18] sm:$0xff] %v1515_v3  ;;  %1518 = vst [vmem:[#allocation16 + $0x10] sm:$0xff] %v1514_v1 }
 0x67c   :  { %2168 = shalt.err (!%p2165_p4)
}
 0x67d   :  { %s2169_s2 = scalar_lea.hbm %s2624_s12, 512 }
 0x67e   :  { %p2170_p5 = scmp.ne.s32.totalorder %s2624_s12, %s2169_s2  ;;  %p2173_p6 = scmp.lt.u32.totalorder %s2169_s2, %s2624_s12 }
 0x680   :  { %p2175_p7 = pnand %p2173_p6, %p2170_p5 }
 0x682   :  { %2178 = shalt.err (!%p2175_p7)
}
 0x683   :  { %1531 = dma.vmem_to_hbm [thread:$0]  %s1526_s25, 512, %s2624_s12, [#allocation6], %s2194_s3, %s2194_s3, %s2195_s24  }
 0x684   :  { %2187 = dma.done.wait [#allocation6], 512  }
 0x685   :  { %2188 = vsyncadd [#allocation6], 4294966784 }
 0x686   :  { %1535 = vsyncpa [#allocation5], 1 }
 0x687   :  { %1536 = vsyncpa [#allocation8], 1 }
 0x688   :  { %1537 = vsyncpa [#allocation11], 1 }
 0x689   :  { %1538 = vsyncpa [#allocation14], 1 }
 0x68a   :  { %1539 = vsyncpa [#allocation6], 1 }

</bundles_post_ra>
